<compile_context>
chip_gen: v6e
topology: v6e:2x2x1
jax: 0.10.0
libtpu: 0.0.40
codegen_flags: <defaults>
</compile_context>

<pallas_src>
import functools

import jax
import jax.numpy as jnp
from jax import lax
from jax.experimental import pallas as pl
from jax.experimental.pallas import tpu as pltpu


def _round_up(n, m):
    return (n + m - 1) // m * m


def _sae_kernel(x_ref, we_ref, be_ref, wd_ref, bd_ref,
                dec_ref, enc_ref, loss_ref,
                *, topk, batch, rows_per_chunk, matmul_dtype):
    i = pl.program_id(0)
    bm = x_ref.shape[0]

    x = x_ref[...]                                            # (bm, Dp) f32

    # ---- Encoder (MXU; low-precision operands, f32 accumulate) + ReLU.
    # Stage h_pre in the `encoded` output block (VMEM) so the top-k pass can
    # work on small row chunks instead of keeping the whole tile in vregs. ---
    h_pre = jnp.dot(x.astype(matmul_dtype), we_ref[...],
                    preferred_element_type=jnp.float32) + be_ref[...]
    enc_ref[...] = jnp.maximum(h_pre, 0.0)                    # (bm, Hp) f32

    # ---- Exact top-k (first-index tie-break, matches torch.topk+scatter_),
    # processed in sublane chunks to bound vector-register pressure. ---------
    neg = jnp.float32(-1e30)
    for c in range(bm // rows_per_chunk):                     # static chunks
        r0 = c * rows_per_chunk
        sub = enc_ref[pl.ds(r0, rows_per_chunk), :]           # (rs, Hp), >= 0
        hp = sub.shape[-1]
        lane = lax.broadcasted_iota(jnp.int32, sub.shape, 1)
        cur = sub
        for _ in range(topk):                                 # static unroll
            m = jnp.max(cur, axis=-1, keepdims=True)
            is_max = cur == m
            idx = jnp.min(jnp.where(is_max, lane, hp), axis=-1, keepdims=True)
            sel = lane == idx                                 # exactly 1 lane
            cur = jnp.where(sel, neg, cur)                    # knock out winner
        # Selected lanes are exactly those knocked down to `neg`.
        enc_ref[pl.ds(r0, rows_per_chunk), :] = jnp.where(cur == neg, sub, 0.0)

    h = enc_ref[...]                                          # (bm, Hp) f32

    # ---- Decoder (MXU) -----------------------------------------------------
    dec = jnp.dot(h.astype(matmul_dtype), wd_ref[...],
                  preferred_element_type=jnp.float32) + bd_ref[...]
    dec_ref[...] = dec

    # ---- Per-tile partial loss sums (padded batch rows masked out) ---------
    row_ok = ((lax.broadcasted_iota(jnp.int32, (bm, 1), 0) + i * bm)
              < batch).astype(jnp.float32)                    # (bm, 1)
    diff = dec - x
    recon_p = jnp.sum(jnp.sum(diff * diff, axis=-1, keepdims=True) * row_ok)
    l1_p = jnp.sum(jnp.sum(h, axis=-1, keepdims=True) * row_ok)      # h >= 0
    l0_p = jnp.sum(jnp.sum((h > 0.0).astype(jnp.float32),
                           axis=-1, keepdims=True) * row_ok)

    # Pack the three scalars into a lane-dense (8,128) output slab:
    # sublane 0 / lanes {0,1,2} hold recon / l1 / l0; everything else is 0.
    sub_i = lax.broadcasted_iota(jnp.int32, (8, 128), 0)
    lane_i = lax.broadcasted_iota(jnp.int32, (8, 128), 1)
    row0 = sub_i == 0
    loss_ref[...] = (jnp.where(row0 & (lane_i == 0), recon_p, 0.0)
                     + jnp.where(row0 & (lane_i == 1), l1_p, 0.0)
                     + jnp.where(row0 & (lane_i == 2), l0_p, 0.0))


@functools.partial(jax.jit, static_argnames=("topk", "bm", "matmul_dtype"))
def sae_forward(x, enc_w, enc_b, dec_w, dec_b, *, topk=10, bm=128,
                matmul_dtype=jnp.bfloat16):
    """x: (B, D_in); enc_w: (H, D_in); dec_w: (D_in, H)  (PyTorch layouts)."""
    B, D = x.shape
    H = enc_w.shape[0]

    # Lane/sublane-aligned padded sizes and batch-tile choice.
    Dp = _round_up(D, 128)
    Hp = _round_up(H, 128)
    bm = _round_up(min(bm, _round_up(B, 8)), 8)
    Bp = _round_up(B, bm)
    n_tiles = Bp // bm
    rs = 32 if bm % 32 == 0 else (16 if bm % 16 == 0 else 8)

    xf = x.astype(jnp.float32)
    x_p = jnp.pad(xf, ((0, Bp - B), (0, Dp - D)))
    we_t = jnp.pad(enc_w.astype(jnp.float32),
                   ((0, Hp - H), (0, Dp - D))).T.astype(matmul_dtype)  # (Dp,Hp)
    be = jnp.pad(enc_b.astype(jnp.float32), (0, Hp - H)).reshape(1, Hp)
    wd_t = jnp.pad(dec_w.astype(jnp.float32),
                   ((0, Dp - D), (0, Hp - H))).T.astype(matmul_dtype)  # (Hp,Dp)
    bd = jnp.pad(dec_b.astype(jnp.float32), (0, Dp - D)).reshape(1, Dp)

    kernel = functools.partial(_sae_kernel, topk=topk, batch=B,
                               rows_per_chunk=rs, matmul_dtype=matmul_dtype)

    vmem = pltpu.MemorySpace.VMEM
    decoded_p, encoded_p, losses = pl.pallas_call(
        kernel,
        grid=(n_tiles,),
        in_specs=[
            pl.BlockSpec((bm, Dp), lambda i: (i, 0)),       # x batch tile
            pl.BlockSpec(memory_space=vmem),                # We^T (resident)
            pl.BlockSpec(memory_space=vmem),                # be
            pl.BlockSpec(memory_space=vmem),                # Wd^T (resident)
            pl.BlockSpec(memory_space=vmem),                # bd
        ],
        out_specs=[
            pl.BlockSpec((bm, Dp), lambda i: (i, 0)),       # decoded
            pl.BlockSpec((bm, Hp), lambda i: (i, 0)),       # encoded
            pl.BlockSpec((8, 128), lambda i: (i, 0)),       # per-tile losses
        ],
        out_shape=(
            jax.ShapeDtypeStruct((Bp, Dp), jnp.float32),
            jax.ShapeDtypeStruct((Bp, Hp), jnp.float32),
            jax.ShapeDtypeStruct((n_tiles * 8, 128), jnp.float32),
        ),
        compiler_params=pltpu.CompilerParams(
            dimension_semantics=("parallel",),
            vmem_limit_bytes=48 * 1024 * 1024,
        ),
    )(x_p, we_t, be, wd_t, bd)

    loss_sums = jnp.sum(losses, axis=0)                      # (128,)
    recon = loss_sums[0] / (B * D)
    l1 = loss_sums[1] / (B * H)
    l0 = loss_sums[2] / (B * H)
    return {
        "decoded": decoded_p[:B, :D],
        "encoded": encoded_p[:B, :H],
        "loss": recon,
        "recon_loss": recon,
        "l1_loss": l1,
        "l0_loss": l0,
    }


def sae_forward_ref(x, enc_w, enc_b, dec_w, dec_b, topk):
    """Pure-JAX reference mirroring the PyTorch module (f32 throughout)."""
    B = x.shape[0]
    h_pre = jax.nn.relu(x @ enc_w.T + enc_b)
    _, idx = lax.top_k(h_pre, topk)
    mask = jnp.zeros_like(h_pre).at[jnp.arange(B)[:, None], idx].set(1.0)
    h = h_pre * mask
    dec = h @ dec_w.T + dec_b
    recon = jnp.mean((dec - x) ** 2)
    return {
        "decoded": dec,
        "encoded": h,
        "loss": recon,
        "recon_loss": recon,
        "l1_loss": jnp.mean(jnp.abs(h)),
        "l0_loss": jnp.mean((h != 0).astype(jnp.float32)),
    }


if __name__ == "__main__":
    TOPK = 10

    # ---- Test 1: strict correctness in f32, padding exercised on every dim.
    B, D_IN, D_HID = 12, 96, 200
    k = jax.random.split(jax.random.PRNGKey(0), 5)
    x = jax.random.normal(k[0], (B, D_IN), dtype=jnp.float32)
    enc_w = jax.random.normal(k[1], (D_HID, D_IN), dtype=jnp.float32) * 0.1
    enc_b = jax.random.normal(k[2], (D_HID,), dtype=jnp.float32) * 0.01
    dec_w = jax.random.normal(k[3], (D_IN, D_HID), dtype=jnp.float32) * 0.1
    dec_b = jax.random.normal(k[4], (D_IN,), dtype=jnp.float32) * 0.01

    out = sae_forward(x, enc_w, enc_b, dec_w, dec_b, topk=TOPK,
                      matmul_dtype=jnp.float32)
    out = jax.tree_util.tree_map(jax.block_until_ready, out)
    ref = sae_forward_ref(x, enc_w, enc_b, dec_w, dec_b, TOPK)

    assert out["decoded"].shape == (B, D_IN)
    assert out["encoded"].shape == (B, D_HID)
    assert jnp.allclose(out["encoded"], ref["encoded"], atol=1e-4, rtol=1e-4)
    assert jnp.allclose(out["decoded"], ref["decoded"], atol=1e-4, rtol=1e-4)
    for name in ("recon_loss", "l1_loss", "l0_loss", "loss"):
        assert jnp.allclose(out[name], ref[name], atol=1e-4, rtol=1e-4), name

    # ---- Test 2: performance configuration (bf16 MXU operands, 128-row
    # tiles, 2-step parallel grid).  bf16 operand rounding can legitimately
    # flip top-k picks on near-ties, so only the tie-robust scalar losses are
    # compared against the f32 reference (plus shape / finiteness checks).
    B2, D2, H2 = 256, 128, 256
    k2 = jax.random.split(jax.random.PRNGKey(1), 5)
    x2 = jax.random.normal(k2[0], (B2, D2), dtype=jnp.float32)
    enc_w2 = jax.random.normal(k2[1], (H2, D2), dtype=jnp.float32) * 0.1
    enc_b2 = jax.random.normal(k2[2], (H2,), dtype=jnp.float32) * 0.01
    dec_w2 = jax.random.normal(k2[3], (D2, H2), dtype=jnp.float32) * 0.1
    dec_b2 = jax.random.normal(k2[4], (D2,), dtype=jnp.float32) * 0.01

    out2 = sae_forward(x2, enc_w2, enc_b2, dec_w2, dec_b2, topk=TOPK,
                       bm=128, matmul_dtype=jnp.bfloat16)
    out2 = jax.tree_util.tree_map(jax.block_until_ready, out2)
    ref2 = sae_forward_ref(x2, enc_w2, enc_b2, dec_w2, dec_b2, TOPK)

    assert out2["decoded"].shape == (B2, D2)
    assert out2["encoded"].shape == (B2, H2)
    assert bool(jnp.all(jnp.isfinite(out2["decoded"])))
    assert bool(jnp.all(jnp.isfinite(out2["encoded"])))
    for name in ("recon_loss", "l1_loss", "l0_loss"):
        assert jnp.allclose(out2[name], ref2[name], rtol=5e-2, atol=1e-3), name

    print("KERNEL_OK")
</pallas_src>

<mosaic_0001>
module attributes {stable_mosaic.version = 11 : i64} {
  func.func @_sae_kernel(%arg0: i32, %arg1: memref<16x128xf32, #tpu.memory_space<vmem>>, %arg2: memref<128x256xf32, #tpu.memory_space<vmem>>, %arg3: memref<1x256xf32, #tpu.memory_space<vmem>>, %arg4: memref<256x128xf32, #tpu.memory_space<vmem>>, %arg5: memref<1x128xf32, #tpu.memory_space<vmem>>, %arg6: memref<16x128xf32, #tpu.memory_space<vmem>>, %arg7: memref<16x256xf32, #tpu.memory_space<vmem>>, %arg8: memref<8x128xf32, #tpu.memory_space<vmem>>) attributes {dimension_semantics = [#tpu.dimension_semantics<parallel>], iteration_bounds = array<i64: 1>, scalar_prefetch = 0 : i64, scratch_operands = 0 : i64, tpu.core_type = #tpu.core_type<tc>, window_params = [{transform_indices = @transform_0, window_bounds = array<i64: 16, 128>}, {pipeline_mode = #tpu.pipeline_mode<synchronous>, transform_indices = @transform_1, window_bounds = array<i64: 128, 256>}, {pipeline_mode = #tpu.pipeline_mode<synchronous>, transform_indices = @transform_2, window_bounds = array<i64: 1, 256>}, {pipeline_mode = #tpu.pipeline_mode<synchronous>, transform_indices = @transform_3, window_bounds = array<i64: 256, 128>}, {pipeline_mode = #tpu.pipeline_mode<synchronous>, transform_indices = @transform_4, window_bounds = array<i64: 1, 128>}, {transform_indices = @transform_5, window_bounds = array<i64: 16, 128>}, {transform_indices = @transform_6, window_bounds = array<i64: 16, 256>}, {transform_indices = @transform_7, window_bounds = array<i64: 8, 128>}]} {
    %c0 = arith.constant 0 : index
    %c0_0 = arith.constant 0 : index
    %0 = vector.load %arg1[%c0, %c0_0] : memref<16x128xf32, #tpu.memory_space<vmem>>, vector<16x128xf32>
    %c0_1 = arith.constant 0 : index
    %c0_2 = arith.constant 0 : index
    %1 = vector.load %arg2[%c0_1, %c0_2] : memref<128x256xf32, #tpu.memory_space<vmem>>, vector<128x256xf32>
    %cst = arith.constant dense<0.000000e+00> : vector<16x256xf32>
    %2 = tpu.matmul %0, %1, %cst {dimension_numbers = #tpu.dot_dimension_numbers<[1], [0], [0], [1], [0, 0, 1, 1], [], []>} : vector<16x128xf32>, vector<128x256xf32>, vector<16x256xf32> -> vector<16x256xf32>
    %c0_3 = arith.constant 0 : index
    %c0_4 = arith.constant 0 : index
    %3 = vector.load %arg3[%c0_3, %c0_4] : memref<1x256xf32, #tpu.memory_space<vmem>>, vector<1x256xf32>
    %4 = vector.broadcast %3 : vector<1x256xf32> to vector<16x256xf32>
    %5 = arith.addf %2, %4 : vector<16x256xf32>
    %cst_5 = arith.constant 0.000000e+00 : f32
    %6 = vector.broadcast %cst_5 : f32 to vector<16x256xf32>
    %7 = arith.maximumf %5, %6 : vector<16x256xf32>
    %c0_6 = arith.constant 0 : index
    %c0_7 = arith.constant 0 : index
    %8 = vector.load %arg7[%c0_6, %c0_7] : memref<16x256xf32, #tpu.memory_space<vmem>>, vector<16x256xf32>
    tpu.vector_store %arg7[%c0_6, %c0_7], %7 {strides = array<i32>} : memref<16x256xf32, #tpu.memory_space<vmem>>, vector<16x256xf32>,
    %c0_8 = arith.constant 0 : index
    %c0_9 = arith.constant 0 : index
    %9 = vector.load %arg7[%c0_8, %c0_9] : memref<16x256xf32, #tpu.memory_space<vmem>>, vector<16x256xf32>
    %10 = tpu.iota {dimensions = array<i32: 1>} : vector<16x256xi32>
    %cst_10 = arith.constant dense<0xFF800000> : vector<16xf32>
    %11 = vector.multi_reduction <maximumf>, %9, %cst_10 [1] : vector<16x256xf32> to vector<16xf32>
    %12 = vector.shape_cast %11 : vector<16xf32> to vector<16x1xf32>
    %13 = vector.broadcast %12 : vector<16x1xf32> to vector<16x256xf32>
    %14 = arith.cmpf oeq, %9, %13 : vector<16x256xf32>
    %c256_i32 = arith.constant 256 : i32
    %15 = vector.broadcast %c256_i32 : i32 to vector<16x256xi32>
    %16 = arith.select %14, %10, %15 : vector<16x256xi1>, vector<16x256xi32>
    %cst_11 = arith.constant dense<2147483647> : vector<16xi32>
    %17 = vector.multi_reduction <minsi>, %16, %cst_11 [1] : vector<16x256xi32> to vector<16xi32>
    %18 = vector.shape_cast %17 : vector<16xi32> to vector<16x1xi32>
    %19 = vector.broadcast %18 : vector<16x1xi32> to vector<16x256xi32>
    %20 = arith.cmpi eq, %10, %19 : vector<16x256xi32>
    %cst_12 = arith.constant -1.000000e+30 : f32
    %21 = vector.broadcast %cst_12 : f32 to vector<16x256xf32>
    %22 = arith.select %20, %21, %9 : vector<16x256xi1>, vector<16x256xf32>
    %cst_13 = arith.constant dense<0xFF800000> : vector<16xf32>
    %23 = vector.multi_reduction <maximumf>, %22, %cst_13 [1] : vector<16x256xf32> to vector<16xf32>
    %24 = vector.shape_cast %23 : vector<16xf32> to vector<16x1xf32>
    %25 = vector.broadcast %24 : vector<16x1xf32> to vector<16x256xf32>
    %26 = arith.cmpf oeq, %22, %25 : vector<16x256xf32>
    %c256_i32_14 = arith.constant 256 : i32
    %27 = vector.broadcast %c256_i32_14 : i32 to vector<16x256xi32>
    %28 = arith.select %26, %10, %27 : vector<16x256xi1>, vector<16x256xi32>
    %cst_15 = arith.constant dense<2147483647> : vector<16xi32>
    %29 = vector.multi_reduction <minsi>, %28, %cst_15 [1] : vector<16x256xi32> to vector<16xi32>
    %30 = vector.shape_cast %29 : vector<16xi32> to vector<16x1xi32>
    %31 = vector.broadcast %30 : vector<16x1xi32> to vector<16x256xi32>
    %32 = arith.cmpi eq, %10, %31 : vector<16x256xi32>
    %cst_16 = arith.constant -1.000000e+30 : f32
    %33 = vector.broadcast %cst_16 : f32 to vector<16x256xf32>
    %34 = arith.select %32, %33, %22 : vector<16x256xi1>, vector<16x256xf32>
    %cst_17 = arith.constant dense<0xFF800000> : vector<16xf32>
    %35 = vector.multi_reduction <maximumf>, %34, %cst_17 [1] : vector<16x256xf32> to vector<16xf32>
    %36 = vector.shape_cast %35 : vector<16xf32> to vector<16x1xf32>
    %37 = vector.broadcast %36 : vector<16x1xf32> to vector<16x256xf32>
    %38 = arith.cmpf oeq, %34, %37 : vector<16x256xf32>
    %c256_i32_18 = arith.constant 256 : i32
    %39 = vector.broadcast %c256_i32_18 : i32 to vector<16x256xi32>
    %40 = arith.select %38, %10, %39 : vector<16x256xi1>, vector<16x256xi32>
    %cst_19 = arith.constant dense<2147483647> : vector<16xi32>
    %41 = vector.multi_reduction <minsi>, %40, %cst_19 [1] : vector<16x256xi32> to vector<16xi32>
    %42 = vector.shape_cast %41 : vector<16xi32> to vector<16x1xi32>
    %43 = vector.broadcast %42 : vector<16x1xi32> to vector<16x256xi32>
    %44 = arith.cmpi eq, %10, %43 : vector<16x256xi32>
    %cst_20 = arith.constant -1.000000e+30 : f32
    %45 = vector.broadcast %cst_20 : f32 to vector<16x256xf32>
    %46 = arith.select %44, %45, %34 : vector<16x256xi1>, vector<16x256xf32>
    %cst_21 = arith.constant dense<0xFF800000> : vector<16xf32>
    %47 = vector.multi_reduction <maximumf>, %46, %cst_21 [1] : vector<16x256xf32> to vector<16xf32>
    %48 = vector.shape_cast %47 : vector<16xf32> to vector<16x1xf32>
    %49 = vector.broadcast %48 : vector<16x1xf32> to vector<16x256xf32>
    %50 = arith.cmpf oeq, %46, %49 : vector<16x256xf32>
    %c256_i32_22 = arith.constant 256 : i32
    %51 = vector.broadcast %c256_i32_22 : i32 to vector<16x256xi32>
    %52 = arith.select %50, %10, %51 : vector<16x256xi1>, vector<16x256xi32>
    %cst_23 = arith.constant dense<2147483647> : vector<16xi32>
    %53 = vector.multi_reduction <minsi>, %52, %cst_23 [1] : vector<16x256xi32> to vector<16xi32>
    %54 = vector.shape_cast %53 : vector<16xi32> to vector<16x1xi32>
    %55 = vector.broadcast %54 : vector<16x1xi32> to vector<16x256xi32>
    %56 = arith.cmpi eq, %10, %55 : vector<16x256xi32>
    %cst_24 = arith.constant -1.000000e+30 : f32
    %57 = vector.broadcast %cst_24 : f32 to vector<16x256xf32>
    %58 = arith.select %56, %57, %46 : vector<16x256xi1>, vector<16x256xf32>
    %cst_25 = arith.constant dense<0xFF800000> : vector<16xf32>
    %59 = vector.multi_reduction <maximumf>, %58, %cst_25 [1] : vector<16x256xf32> to vector<16xf32>
    %60 = vector.shape_cast %59 : vector<16xf32> to vector<16x1xf32>
    %61 = vector.broadcast %60 : vector<16x1xf32> to vector<16x256xf32>
    %62 = arith.cmpf oeq, %58, %61 : vector<16x256xf32>
    %c256_i32_26 = arith.constant 256 : i32
    %63 = vector.broadcast %c256_i32_26 : i32 to vector<16x256xi32>
    %64 = arith.select %62, %10, %63 : vector<16x256xi1>, vector<16x256xi32>
    %cst_27 = arith.constant dense<2147483647> : vector<16xi32>
    %65 = vector.multi_reduction <minsi>, %64, %cst_27 [1] : vector<16x256xi32> to vector<16xi32>
    %66 = vector.shape_cast %65 : vector<16xi32> to vector<16x1xi32>
    %67 = vector.broadcast %66 : vector<16x1xi32> to vector<16x256xi32>
    %68 = arith.cmpi eq, %10, %67 : vector<16x256xi32>
    %cst_28 = arith.constant -1.000000e+30 : f32
    %69 = vector.broadcast %cst_28 : f32 to vector<16x256xf32>
    %70 = arith.select %68, %69, %58 : vector<16x256xi1>, vector<16x256xf32>
    %cst_29 = arith.constant dense<0xFF800000> : vector<16xf32>
    %71 = vector.multi_reduction <maximumf>, %70, %cst_29 [1] : vector<16x256xf32> to vector<16xf32>
    %72 = vector.shape_cast %71 : vector<16xf32> to vector<16x1xf32>
    %73 = vector.broadcast %72 : vector<16x1xf32> to vector<16x256xf32>
    %74 = arith.cmpf oeq, %70, %73 : vector<16x256xf32>
    %c256_i32_30 = arith.constant 256 : i32
    %75 = vector.broadcast %c256_i32_30 : i32 to vector<16x256xi32>
    %76 = arith.select %74, %10, %75 : vector<16x256xi1>, vector<16x256xi32>
    %cst_31 = arith.constant dense<2147483647> : vector<16xi32>
    %77 = vector.multi_reduction <minsi>, %76, %cst_31 [1] : vector<16x256xi32> to vector<16xi32>
    %78 = vector.shape_cast %77 : vector<16xi32> to vector<16x1xi32>
    %79 = vector.broadcast %78 : vector<16x1xi32> to vector<16x256xi32>
    %80 = arith.cmpi eq, %10, %79 : vector<16x256xi32>
    %cst_32 = arith.constant -1.000000e+30 : f32
    %81 = vector.broadcast %cst_32 : f32 to vector<16x256xf32>
    %82 = arith.select %80, %81, %70 : vector<16x256xi1>, vector<16x256xf32>
    %cst_33 = arith.constant dense<0xFF800000> : vector<16xf32>
    %83 = vector.multi_reduction <maximumf>, %82, %cst_33 [1] : vector<16x256xf32> to vector<16xf32>
    %84 = vector.shape_cast %83 : vector<16xf32> to vector<16x1xf32>
    %85 = vector.broadcast %84 : vector<16x1xf32> to vector<16x256xf32>
    %86 = arith.cmpf oeq, %82, %85 : vector<16x256xf32>
    %c256_i32_34 = arith.constant 256 : i32
    %87 = vector.broadcast %c256_i32_34 : i32 to vector<16x256xi32>
    %88 = arith.select %86, %10, %87 : vector<16x256xi1>, vector<16x256xi32>
    %cst_35 = arith.constant dense<2147483647> : vector<16xi32>
    %89 = vector.multi_reduction <minsi>, %88, %cst_35 [1] : vector<16x256xi32> to vector<16xi32>
    %90 = vector.shape_cast %89 : vector<16xi32> to vector<16x1xi32>
    %91 = vector.broadcast %90 : vector<16x1xi32> to vector<16x256xi32>
    %92 = arith.cmpi eq, %10, %91 : vector<16x256xi32>
    %cst_36 = arith.constant -1.000000e+30 : f32
    %93 = vector.broadcast %cst_36 : f32 to vector<16x256xf32>
    %94 = arith.select %92, %93, %82 : vector<16x256xi1>, vector<16x256xf32>
    %cst_37 = arith.constant dense<0xFF800000> : vector<16xf32>
    %95 = vector.multi_reduction <maximumf>, %94, %cst_37 [1] : vector<16x256xf32> to vector<16xf32>
    %96 = vector.shape_cast %95 : vector<16xf32> to vector<16x1xf32>
    %97 = vector.broadcast %96 : vector<16x1xf32> to vector<16x256xf32>
    %98 = arith.cmpf oeq, %94, %97 : vector<16x256xf32>
    %c256_i32_38 = arith.constant 256 : i32
    %99 = vector.broadcast %c256_i32_38 : i32 to vector<16x256xi32>
    %100 = arith.select %98, %10, %99 : vector<16x256xi1>, vector<16x256xi32>
    %cst_39 = arith.constant dense<2147483647> : vector<16xi32>
    %101 = vector.multi_reduction <minsi>, %100, %cst_39 [1] : vector<16x256xi32> to vector<16xi32>
    %102 = vector.shape_cast %101 : vector<16xi32> to vector<16x1xi32>
    %103 = vector.broadcast %102 : vector<16x1xi32> to vector<16x256xi32>
    %104 = arith.cmpi eq, %10, %103 : vector<16x256xi32>
    %cst_40 = arith.constant -1.000000e+30 : f32
    %105 = vector.broadcast %cst_40 : f32 to vector<16x256xf32>
    %106 = arith.select %104, %105, %94 : vector<16x256xi1>, vector<16x256xf32>
    %cst_41 = arith.constant dense<0xFF800000> : vector<16xf32>
    %107 = vector.multi_reduction <maximumf>, %106, %cst_41 [1] : vector<16x256xf32> to vector<16xf32>
    %108 = vector.shape_cast %107 : vector<16xf32> to vector<16x1xf32>
    %109 = vector.broadcast %108 : vector<16x1xf32> to vector<16x256xf32>
    %110 = arith.cmpf oeq, %106, %109 : vector<16x256xf32>
    %c256_i32_42 = arith.constant 256 : i32
    %111 = vector.broadcast %c256_i32_42 : i32 to vector<16x256xi32>
    %112 = arith.select %110, %10, %111 : vector<16x256xi1>, vector<16x256xi32>
    %cst_43 = arith.constant dense<2147483647> : vector<16xi32>
    %113 = vector.multi_reduction <minsi>, %112, %cst_43 [1] : vector<16x256xi32> to vector<16xi32>
    %114 = vector.shape_cast %113 : vector<16xi32> to vector<16x1xi32>
    %115 = vector.broadcast %114 : vector<16x1xi32> to vector<16x256xi32>
    %116 = arith.cmpi eq, %10, %115 : vector<16x256xi32>
    %cst_44 = arith.constant -1.000000e+30 : f32
    %117 = vector.broadcast %cst_44 : f32 to vector<16x256xf32>
    %118 = arith.select %116, %117, %106 : vector<16x256xi1>, vector<16x256xf32>
    %cst_45 = arith.constant dense<0xFF800000> : vector<16xf32>
    %119 = vector.multi_reduction <maximumf>, %118, %cst_45 [1] : vector<16x256xf32> to vector<16xf32>
    %120 = vector.shape_cast %119 : vector<16xf32> to vector<16x1xf32>
    %121 = vector.broadcast %120 : vector<16x1xf32> to vector<16x256xf32>
    %122 = arith.cmpf oeq, %118, %121 : vector<16x256xf32>
    %c256_i32_46 = arith.constant 256 : i32
    %123 = vector.broadcast %c256_i32_46 : i32 to vector<16x256xi32>
    %124 = arith.select %122, %10, %123 : vector<16x256xi1>, vector<16x256xi32>
    %cst_47 = arith.constant dense<2147483647> : vector<16xi32>
    %125 = vector.multi_reduction <minsi>, %124, %cst_47 [1] : vector<16x256xi32> to vector<16xi32>
    %126 = vector.shape_cast %125 : vector<16xi32> to vector<16x1xi32>
    %127 = vector.broadcast %126 : vector<16x1xi32> to vector<16x256xi32>
    %128 = arith.cmpi eq, %10, %127 : vector<16x256xi32>
    %cst_48 = arith.constant -1.000000e+30 : f32
    %129 = vector.broadcast %cst_48 : f32 to vector<16x256xf32>
    %130 = arith.select %128, %129, %118 : vector<16x256xi1>, vector<16x256xf32>
    %cst_49 = arith.constant -1.000000e+30 : f32
    %131 = vector.broadcast %cst_49 : f32 to vector<16x256xf32>
    %132 = arith.cmpf oeq, %130, %131 : vector<16x256xf32>
    %cst_50 = arith.constant 0.000000e+00 : f32
    %133 = vector.broadcast %cst_50 : f32 to vector<16x256xf32>
    %134 = arith.select %132, %9, %133 : vector<16x256xi1>, vector<16x256xf32>
    %c0_51 = arith.constant 0 : index
    %c0_52 = arith.constant 0 : index
    %135 = vector.load %arg7[%c0_51, %c0_52] : memref<16x256xf32, #tpu.memory_space<vmem>>, vector<16x256xf32>
    tpu.vector_store %arg7[%c0_51, %c0_52], %134 {strides = array<i32>} : memref<16x256xf32, #tpu.memory_space<vmem>>, vector<16x256xf32>,
    %c0_53 = arith.constant 0 : index
    %c0_54 = arith.constant 0 : index
    %136 = vector.load %arg7[%c0_53, %c0_54] : memref<16x256xf32, #tpu.memory_space<vmem>>, vector<16x256xf32>
    %c0_55 = arith.constant 0 : index
    %c0_56 = arith.constant 0 : index
    %137 = vector.load %arg4[%c0_55, %c0_56] : memref<256x128xf32, #tpu.memory_space<vmem>>, vector<256x128xf32>
    %cst_57 = arith.constant dense<0.000000e+00> : vector<16x128xf32>
    %138 = tpu.matmul %136, %137, %cst_57 {dimension_numbers = #tpu.dot_dimension_numbers<[1], [0], [0], [1], [0, 0, 1, 1], [], []>} : vector<16x256xf32>, vector<256x128xf32>, vector<16x128xf32> -> vector<16x128xf32>
    %c0_58 = arith.constant 0 : index
    %c0_59 = arith.constant 0 : index
    %139 = vector.load %arg5[%c0_58, %c0_59] : memref<1x128xf32, #tpu.memory_space<vmem>>, vector<1x128xf32>
    %140 = vector.broadcast %139 : vector<1x128xf32> to vector<16x128xf32>
    %141 = arith.addf %138, %140 : vector<16x128xf32>
    %c0_60 = arith.constant 0 : index
    %c0_61 = arith.constant 0 : index
    %142 = vector.load %arg6[%c0_60, %c0_61] : memref<16x128xf32, #tpu.memory_space<vmem>>, vector<16x128xf32>
    tpu.vector_store %arg6[%c0_60, %c0_61], %141 {strides = array<i32>} : memref<16x128xf32, #tpu.memory_space<vmem>>, vector<16x128xf32>,
    %143 = tpu.iota {dimensions = array<i32: 0>} : vector<16x1xi32>
    %c16_i32 = arith.constant 16 : i32
    %144 = arith.muli %arg0, %c16_i32 : i32
    %145 = vector.broadcast %144 : i32 to vector<16x1xi32>
    %146 = arith.addi %143, %145 : vector<16x1xi32>
    %c12_i32 = arith.constant 12 : i32
    %147 = vector.broadcast %c12_i32 : i32 to vector<16x1xi32>
    %148 = arith.cmpi slt, %146, %147 : vector<16x1xi32>
    %149 = arith.extui %148 : vector<16x1xi1> to vector<16x1xi32>
    %150 = arith.sitofp %149 : vector<16x1xi32> to vector<16x1xf32>
    %151 = arith.subf %141, %0 : vector<16x128xf32>
    %152 = arith.mulf %151, %151 : vector<16x128xf32>
    %cst_62 = arith.constant dense<0.000000e+00> : vector<16xf32>
    %153 = vector.multi_reduction <add>, %152, %cst_62 [1] : vector<16x128xf32> to vector<16xf32>
    %154 = vector.shape_cast %153 : vector<16xf32> to vector<16x1xf32>
    %155 = arith.mulf %154, %150 : vector<16x1xf32>
    %156 = vector.shape_cast %155 : vector<16x1xf32> to vector<1x16x1xf32>
    %cst_63 = arith.constant dense<0.000000e+00> : vector<1xf32>
    %157 = vector.multi_reduction <add>, %156, %cst_63 [1, 2] : vector<1x16x1xf32> to vector<1xf32>
    %158 = vector.shape_cast %157 : vector<1xf32> to vector<1x1x1xf32>
    %159 = vector.extract %158[0, 0, 0] : f32 from vector<1x1x1xf32>
    %cst_64 = arith.constant dense<0.000000e+00> : vector<16xf32>
    %160 = vector.multi_reduction <add>, %136, %cst_64 [1] : vector<16x256xf32> to vector<16xf32>
    %161 = vector.shape_cast %160 : vector<16xf32> to vector<16x1xf32>
    %162 = arith.mulf %161, %150 : vector<16x1xf32>
    %163 = vector.shape_cast %162 : vector<16x1xf32> to vector<1x16x1xf32>
    %cst_65 = arith.constant dense<0.000000e+00> : vector<1xf32>
    %164 = vector.multi_reduction <add>, %163, %cst_65 [1, 2] : vector<1x16x1xf32> to vector<1xf32>
    %165 = vector.shape_cast %164 : vector<1xf32> to vector<1x1x1xf32>
    %166 = vector.extract %165[0, 0, 0] : f32 from vector<1x1x1xf32>
    %cst_66 = arith.constant 0.000000e+00 : f32
    %167 = vector.broadcast %cst_66 : f32 to vector<16x256xf32>
    %168 = arith.cmpf ogt, %136, %167 : vector<16x256xf32>
    %169 = arith.extui %168 : vector<16x256xi1> to vector<16x256xi32>
    %170 = arith.sitofp %169 : vector<16x256xi32> to vector<16x256xf32>
    %cst_67 = arith.constant dense<0.000000e+00> : vector<16xf32>
    %171 = vector.multi_reduction <add>, %170, %cst_67 [1] : vector<16x256xf32> to vector<16xf32>
    %172 = vector.shape_cast %171 : vector<16xf32> to vector<16x1xf32>
    %173 = arith.mulf %172, %150 : vector<16x1xf32>
    %174 = vector.shape_cast %173 : vector<16x1xf32> to vector<1x16x1xf32>
    %cst_68 = arith.constant dense<0.000000e+00> : vector<1xf32>
    %175 = vector.multi_reduction <add>, %174, %cst_68 [1, 2] : vector<1x16x1xf32> to vector<1xf32>
    %176 = vector.shape_cast %175 : vector<1xf32> to vector<1x1x1xf32>
    %177 = vector.extract %176[0, 0, 0] : f32 from vector<1x1x1xf32>
    %178 = tpu.iota {dimensions = array<i32: 0>} : vector<8x128xi32>
    %179 = tpu.iota {dimensions = array<i32: 1>} : vector<8x128xi32>
    %c0_i32 = arith.constant 0 : i32
    %180 = vector.broadcast %c0_i32 : i32 to vector<8x128xi32>
    %181 = arith.cmpi eq, %178, %180 : vector<8x128xi32>
    %c0_i32_69 = arith.constant 0 : i32
    %182 = vector.broadcast %c0_i32_69 : i32 to vector<8x128xi32>
    %183 = arith.cmpi eq, %179, %182 : vector<8x128xi32>
    %184 = arith.andi %181, %183 : vector<8x128xi1>
    %cst_70 = arith.constant 0.000000e+00 : f32
    %185 = vector.broadcast %159 : f32 to vector<8x128xf32>
    %186 = vector.broadcast %cst_70 : f32 to vector<8x128xf32>
    %187 = arith.select %184, %185, %186 : vector<8x128xi1>, vector<8x128xf32>
    %c1_i32 = arith.constant 1 : i32
    %188 = vector.broadcast %c1_i32 : i32 to vector<8x128xi32>
    %189 = arith.cmpi eq, %179, %188 : vector<8x128xi32>
    %190 = arith.andi %181, %189 : vector<8x128xi1>
    %cst_71 = arith.constant 0.000000e+00 : f32
    %191 = vector.broadcast %166 : f32 to vector<8x128xf32>
    %192 = vector.broadcast %cst_71 : f32 to vector<8x128xf32>
    %193 = arith.select %190, %191, %192 : vector<8x128xi1>, vector<8x128xf32>
    %194 = arith.addf %187, %193 : vector<8x128xf32>
    %c2_i32 = arith.constant 2 : i32
    %195 = vector.broadcast %c2_i32 : i32 to vector<8x128xi32>
    %196 = arith.cmpi eq, %179, %195 : vector<8x128xi32>
    %197 = arith.andi %181, %196 : vector<8x128xi1>
    %cst_72 = arith.constant 0.000000e+00 : f32
    %198 = vector.broadcast %177 : f32 to vector<8x128xf32>
    %199 = vector.broadcast %cst_72 : f32 to vector<8x128xf32>
    %200 = arith.select %197, %198, %199 : vector<8x128xi1>, vector<8x128xf32>
    %201 = arith.addf %194, %200 : vector<8x128xf32>
    %c0_73 = arith.constant 0 : index
    %c0_74 = arith.constant 0 : index
    %202 = vector.load %arg8[%c0_73, %c0_74] : memref<8x128xf32, #tpu.memory_space<vmem>>, vector<8x128xf32>
    tpu.vector_store %arg8[%c0_73, %c0_74], %201 {strides = array<i32>} : memref<8x128xf32, #tpu.memory_space<vmem>>, vector<8x128xf32>,
    return
  }
  func.func @transform_0(%arg0: i32) -> (i32, i32) {
    %c0_i32 = arith.constant 0 : i32
    %c0_i32_0 = arith.constant 0 : i32
    return %arg0, %c0_i32 : i32, i32
  }
  func.func @transform_1(%arg0: i32) -> (i32, i32) {
    %c0_i32 = arith.constant 0 : i32
    %c0_i32_0 = arith.constant 0 : i32
    %c0_i32_1 = arith.constant 0 : i32
    return %c0_i32, %c0_i32_0 : i32, i32
  }
  func.func @transform_2(%arg0: i32) -> (i32, i32) {
    %c0_i32 = arith.constant 0 : i32
    %c0_i32_0 = arith.constant 0 : i32
    %c0_i32_1 = arith.constant 0 : i32
    return %c0_i32, %c0_i32_0 : i32, i32
  }
  func.func @transform_3(%arg0: i32) -> (i32, i32) {
    %c0_i32 = arith.constant 0 : i32
    %c0_i32_0 = arith.constant 0 : i32
    %c0_i32_1 = arith.constant 0 : i32
    return %c0_i32, %c0_i32_0 : i32, i32
  }
  func.func @transform_4(%arg0: i32) -> (i32, i32) {
    %c0_i32 = arith.constant 0 : i32
    %c0_i32_0 = arith.constant 0 : i32
    %c0_i32_1 = arith.constant 0 : i32
    return %c0_i32, %c0_i32_0 : i32, i32
  }
  func.func @transform_5(%arg0: i32) -> (i32, i32) {
    %c0_i32 = arith.constant 0 : i32
    %c0_i32_0 = arith.constant 0 : i32
    return %arg0, %c0_i32 : i32, i32
  }
  func.func @transform_6(%arg0: i32) -> (i32, i32) {
    %c0_i32 = arith.constant 0 : i32
    %c0_i32_0 = arith.constant 0 : i32
    return %arg0, %c0_i32 : i32, i32
  }
  func.func @transform_7(%arg0: i32) -> (i32, i32) {
    %c0_i32 = arith.constant 0 : i32
    %c0_i32_0 = arith.constant 0 : i32
    return %arg0, %c0_i32 : i32, i32
  }
}

</mosaic_0001>

<bundles_post_ra>
// kernel: sae_forward.1
= control target key start
LH: loop header
LB: loop body
LE: loop exit
PB: predicated region body
PF: predicated region fallthrough
CT: control target
= control target key end

     0   :  { %13 = vsyncpa [#allocation3], 0  ;;  %v1082_v4 = vmov 0.0   ;;  %s1503_s0 = inlined_call_operand.vmem [shape: f32[16,128], index: 0, kind: input, shape index: {}]   ;;  %s1504_s1 = inlined_call_operand.vmem [shape: f32[128,256], index: 1, kind: input, shape index: {}]   ;;  %s1505_s2 = inlined_call_operand.vmem [shape: f32[1,256], index: 2, kind: input, shape index: {}]   ;;  %s1506_s3 = inlined_call_operand.vmem [shape: f32[256,128], index: 3, kind: input, shape index: {}]   ;;  %s1507_s4 = inlined_call_operand.vmem [shape: f32[1,128], index: 4, kind: input, shape index: {}]   ;;  %s1508_s5 = inlined_call_operand.hbm [shape: f32[16,128], index: 5, kind: output, shape index: {0}]   ;;  %s1509_s6 = inlined_call_operand.hbm [shape: f32[16,256], index: 6, kind: output, shape index: {1}]   ;;  %s1510_s7 = inlined_call_operand.vmem [shape: f32[8,128], index: 7, kind: output, shape index: {2}]  }
   0x1   :  { %v58_v0 = vld [vmem:[%s1504_s1 + $0xf8] sm:$0xff]  ;;  %v57_v1 = vld [vmem:[%s1504_s1 + $0xf0] sm:$0xff]  ;;  %v56_v2 = vld [vmem:[%s1504_s1 + $0xe8] sm:$0xff]  ;;  %135 = vmatprep.mubr.f32.mxu0 %v1082_v4 }
   0x2   :  { %71 = vmatprep.subr.mxu0 %v58_v0  ;;  %v55_v3 = vld [vmem:[%s1504_s1 + $0xe0] sm:$0xff]  ;;  %v54_v5 = vld [vmem:[%s1504_s1 + $0xd8] sm:$0xff]  ;;  %v53_v6 = vld [vmem:[%s1504_s1 + $0xd0] sm:$0xff] }
   0x3   :  { %72 = vmatpush1.msra.mxu0 %v57_v1  ;;  %v52_v7 = vld [vmem:[%s1504_s1 + $0xc8] sm:$0xff]  ;;  %v51_v8 = vld [vmem:[%s1504_s1 + $0xc0] sm:$0xff]  ;;  %v50_v9 = vld [vmem:[%s1504_s1 + $0xb8] sm:$0xff] }
   0x4   :  { %73 = vmatprep.subr.mxu0 %v56_v2  ;;  %v49_v10 = vld [vmem:[%s1504_s1 + $0xb0] sm:$0xff]  ;;  %v48_v11 = vld [vmem:[%s1504_s1 + $0xa8] sm:$0xff]  ;;  %v47_v12 = vld [vmem:[%s1504_s1 + $0xa0] sm:$0xff] }
   0x5   :  { %74 = vmatpush1.msra.mxu0 %v55_v3  ;;  %v46_v13 = vld [vmem:[%s1504_s1 + $0x98] sm:$0xff]  ;;  %v45_v14 = vld [vmem:[%s1504_s1 + $0x90] sm:$0xff] }
   0x6   :  { %75 = vmatprep.subr.mxu0 %v54_v5 }
   0x7   :  { %76 = vmatpush1.msra.mxu0 %v53_v6 }
   0x8   :  { %77 = vmatprep.subr.mxu0 %v52_v7 }
   0x9   :  { %78 = vmatpush1.msra.mxu0 %v51_v8 }
   0xa   :  { %79 = vmatprep.subr.mxu0 %v50_v9 }
   0xb   :  { %80 = vmatpush1.msra.mxu0 %v49_v10 }
   0xc   :  { %81 = vmatprep.subr.mxu0 %v48_v11 }
   0xd   :  { %14 = vsyncpa [#allocation5], 0  ;;  %82 = vmatpush1.msra.mxu0 %v47_v12  ;;  %v44_v15 = vld [vmem:[%s1504_s1 + $0x88] sm:$0xff]  ;;  %v43_v16 = vld [vmem:[%s1504_s1 + $0x80] sm:$0xff]  ;;  %v61_v35 = vlaneseq  ;;  %s1084_s19 = smov [#allocation4]  }
   0xe   :  { %83 = vmatprep.subr.mxu0 %v46_v13  ;;  %v42_v17 = vld [vmem:[%s1504_s1 + $0x78] sm:$0xff]  ;;  %v41_v18 = vld [vmem:[%s1504_s1 + $0x70] sm:$0xff]  ;;  %v40_v19 = vld [vmem:[%s1504_s1 + $0x68] sm:$0xff]  ;;  %s956_s20 = sshll.u32 %s1084_s19, 4  ;;  %s957_s20 = int_to_ptr.vmem [resolvable:$true] %s956_s20 }
   0xf   :  { %84 = vmatpush1.msra.mxu0 %v45_v14  ;;  %v39_v20 = vld [vmem:[%s1504_s1 + $0x60] sm:$0xff]  ;;  %v38_v21 = vld [vmem:[%s1504_s1 + $0x58] sm:$0xff]  ;;  %v37_v22 = vld [vmem:[%s1504_s1 + $0x50] sm:$0xff]  ;;  %v1233_v36 = vshrl.u32 %v61_v35, 7  ;;  %v1252_v56 = vand.u32 127, %v61_v35 }
  0x10   :  { %85 = vmatprep.subr.mxu0 %v44_v15  ;;  %v36_v23 = vld [vmem:[%s1504_s1 + $0x48] sm:$0xff]  ;;  %v35_v24 = vld [vmem:[%s1504_s1 + $0x40] sm:$0xff]  ;;  %v34_v25 = vld [vmem:[%s1504_s1 + $0x38] sm:$0xff] }
  0x11   :  { %86 = vmatpush1.msra.mxu0 %v43_v16  ;;  %v33_v26 = vld [vmem:[%s1504_s1 + $0x30] sm:$0xff]  ;;  %v32_v27 = vld [vmem:[%s1504_s1 + $0x28] sm:$0xff]  ;;  %v31_v28 = vld [vmem:[%s1504_s1 + $0x20] sm:$0xff]  ;;  %v63_v37 = vsub.s32 0, %v1233_v36  ;;  %v67_v39 = vsub.s32 1, %v1233_v36  ;;  %v1255_v57 = vadd.s32 128, %v1252_v56 }
  0x12   :  { %87 = vmatprep.subr.mxu0 %v42_v17  ;;  %v30_v29 = vld [vmem:[%s1504_s1 + $0x18] sm:$0xff]  ;;  %v29_v30 = vld [vmem:[%s1504_s1 + $0x10] sm:$0xff]  ;;  %v28_v31 = vld [vmem:[%s1504_s1 + $0x8] sm:$0xff] }
  0x13   :  { %88 = vmatpush1.msra.mxu0 %v41_v18  ;;  %v27_v32 = vld [vmem:[%s1504_s1] sm:$0xff]  ;;  %v26_v34 = vld [vmem:[%s1503_s0 + $0x8] sm:$0xff] }
  0x14   :  { %89 = vmatprep.subr.mxu0 %v40_v19  ;;  %v25_v33 = vld [vmem:[%s1503_s0] sm:$0xff] }
  0x15   :  { %90 = vmatpush1.msra.mxu0 %v39_v20  ;;  %v59_v38 = vld [vmem:[%s1505_s2] sm:$0x3] }
  0x16   :  { %91 = vmatprep.subr.mxu0 %v38_v21  ;;  %v64_v40 = vrot.slane %v59_v38, %v63_v37  ;;  %v68_v41 = vrot.slane %v59_v38, %v67_v39 }
  0x17   :  { %92 = vmatpush1.msra.mxu0 %v37_v22 }
  0x18   :  { %93 = vmatprep.subr.mxu0 %v36_v23 }
  0x19   :  { %94 = vmatpush1.msra.mxu0 %v35_v24 }
  0x1a   :  { %95 = vmatprep.subr.mxu0 %v34_v25 }
  0x1b   :  { %96 = vmatpush1.msra.mxu0 %v33_v26 }
  0x1c   :  { %97 = vmatprep.subr.mxu0 %v32_v27 }
  0x1d   :  { %98 = vmatpush1.msra.mxu0 %v31_v28 }
  0x1e   :  { %99 = vmatprep.subr.mxu0 %v30_v29 }
  0x1f   :  { %100 = vmatpush1.msra.mxu0 %v29_v30 }
  0x20   :  { %101 = vmatprep.subr.mxu0 %v28_v31 }
  0x21   :  { %102 = vmatpush1.msra.mxu0 %v27_v32 }
  0x22   :  { %136 = vmatmul.mubr.f32.vlgmr.msra.gmra.mxu0 %v25_v33 }
  0x23   :  { %141 = vmatprep.mubr.f32.mxu0 %v1082_v4 }
  0x26   :  { %142 = vmatmul.mubr.f32.gmra.mxu0 %v26_v34 }
  0xe2   :  { %v137_v42 = vpop.f32.mrf.mxu0 }
  0xe3   :  { %v138_v43 = vadd.f32 %v137_v42, %v64_v40 }
  0xe4   :  { %v139_v44 = vpop.f32.mrf.mxu0 }
  0xe5   :  { %v140_v45 = vadd.f32 %v139_v44, %v68_v41  ;;  %v1240_v47 = vmax.f32 %v138_v43, 0.0 }
  0xe6   :  { %v143_v46 = vpop.f32.mrf.mxu0 }
  0xe7   :  { %v1242_v48 = vmax.f32 %v140_v45, 0.0  ;;  %v144_v49 = vadd.f32 %v143_v46, %v64_v40 }
  0xe8   :  { %v145_v50 = vpop.f32.mrf.mxu0 }
  0xe9   :  { %v146_v51 = vadd.f32 %v145_v50, %v68_v41  ;;  %v163_v52 = vmax.f32 %v1240_v47, %v1242_v48  ;;  %v1246_v53 = vmax.f32 %v144_v49, 0.0 }
  0xeb   :  { %v1248_v54 = vmax.f32 %v146_v51, 0.0  ;;  %164 = vmax.xlane.f32.xlu0 %v163_v52 }
  0xed   :  { %v166_v55 = vmax.f32 %v1246_v53, %v1248_v54 }
  0xef   :  { %167 = vmax.xlane.f32.xlu0 %v166_v55 }
 0x174   :  { %v165_v58 = vpop.xlane.xlu0 %164 }
 0x175   :  { %vm169_vm0 = vcmp.eq.f32.partialorder %v1240_v47, %v165_v58  ;;  %vm170_vm1 = vcmp.eq.f32.partialorder %v1242_v48, %v165_v58 }
 0x176   :  { %v173_v59 = vsel %vm169_vm0, %v1252_v56, 256  ;;  %v174_v60 = vsel %vm170_vm1, %v1255_v57, 256 }
 0x177   :  { %vm177_vm2 = vcmp.lt.s32.totalorder %v173_v59, %v174_v60 }
 0x178   :  { %v168_v61 = vpop.xlane.xlu0 %167  ;;  %v178_v62 = vsel %vm177_vm2, %v173_v59, %v174_v60 }
 0x179   :  { %vm171_vm3 = vcmp.eq.f32.partialorder %v1246_v53, %v168_v61  ;;  %vm172_vm4 = vcmp.eq.f32.partialorder %v1248_v54, %v168_v61  ;;  %v180_v63 = vshra.s32 %v178_v62, 16  ;;  %v179_v7 = vand.u32 65535, %v178_v62 }
 0x17a   :  { %v175_v0 = vsel %vm171_vm3, %v1252_v56, 256  ;;  %v176_v1 = vsel %vm172_vm4, %v1255_v57, 256 }
 0x17b   :  { %vm193_vm5 = vcmp.lt.s32.totalorder %v175_v0, %v176_v1  ;;  %v182_v2 = vcvt.s32.f32 %v180_v63  ;;  %v181_v9 = vcvt.s32.f32 %v179_v7 }
 0x17c   :  { %v194_v3 = vsel %vm193_vm5, %v175_v0, %v176_v1 }
 0x17d   :  { %183 = vmin.xlane.f32.xlu1 %v182_v2  ;;  %v196_v5 = vshra.s32 %v194_v3, 16  ;;  %v195_v10 = vand.u32 65535, %v194_v3 }
 0x17f   :  { %v198_v6 = vcvt.s32.f32 %v196_v5  ;;  %v197_v13 = vcvt.s32.f32 %v195_v10 }
 0x181   :  { %199 = vmin.xlane.f32.xlu1 %v198_v6 }
 0x206   :  { %v184_v8 = vpop.xlane.xlu1 %183 }
 0x207   :  { %vm185_vm6 = vcmp.eq.f32.partialorder %v182_v2, %v184_v8  ;;  %v190_v15 = vcvt.f32.s32 %v184_v8 }
 0x208   :  { %v186_v11 = vsel %vm185_vm6, %v181_v9, inf }
 0x209   :  { %187 = vmin.xlane.f32.xlu0 %v186_v11  ;;  %v191_v17 = vshll.u32 %v190_v15, 16 }
 0x20a   :  { %v200_v12 = vpop.xlane.xlu1 %199 }
 0x20b   :  { %vm201_vm7 = vcmp.eq.f32.partialorder %v198_v6, %v200_v12  ;;  %v206_v18 = vcvt.f32.s32 %v200_v12 }
 0x20c   :  { %v202_v14 = vsel %vm201_vm7, %v197_v13, inf }
 0x20d   :  { %203 = vmin.xlane.f32.xlu1 %v202_v14  ;;  %v207_v22 = vshll.u32 %v206_v18, 16 }
 0x292   :  { %v188_v16 = vpop.xlane.xlu0 %187 }
 0x293   :  { %v189_v19 = vcvt.f32.s32 %v188_v16 }
 0x295   :  { %v192_v20 = vadd.s32 %v191_v17, %v189_v19 }
 0x296   :  { %v204_v21 = vpop.xlane.xlu1 %203 }
 0x297   :  { %vm209_vm8 = vcmp.eq.s32.totalorder %v1252_v56, %v192_v20  ;;  %vm210_vm9 = vcmp.eq.s32.totalorder %v1255_v57, %v192_v20  ;;  %v205_v23 = vcvt.f32.s32 %v204_v21 }
 0x298   :  { %v213_v24 = vsel %vm209_vm8, -1e+30, %v1240_v47  ;;  %v214_v25 = vsel %vm210_vm9, -1e+30, %v1242_v48 }
 0x299   :  { %v208_v26 = vadd.s32 %v207_v22, %v205_v23  ;;  %v217_v27 = vmax.f32 %v213_v24, %v214_v25 }
 0x29b   :  { %vm211_vm10 = vcmp.eq.s32.totalorder %v1252_v56, %v208_v26  ;;  %vm212_vm11 = vcmp.eq.s32.totalorder %v1255_v57, %v208_v26  ;;  %218 = vmax.xlane.f32.xlu0 %v217_v27 }
 0x29c   :  { %v215_v28 = vsel %vm211_vm10, -1e+30, %v1246_v53  ;;  %v216_v29 = vsel %vm212_vm11, -1e+30, %v1248_v54 }
 0x29d   :  { %v220_v30 = vmax.f32 %v215_v28, %v216_v29 }
 0x29f   :  { %221 = vmax.xlane.f32.xlu1 %v220_v30 }
 0x324   :  { %v219_v31 = vpop.xlane.xlu0 %218 }
 0x325   :  { %vm223_vm12 = vcmp.eq.f32.partialorder %v213_v24, %v219_v31  ;;  %vm224_vm13 = vcmp.eq.f32.partialorder %v214_v25, %v219_v31 }
 0x326   :  { %v227_v32 = vsel %vm223_vm12, %v1252_v56, 256  ;;  %v228_v33 = vsel %vm224_vm13, %v1255_v57, 256 }
 0x327   :  { %vm231_vm14 = vcmp.lt.s32.totalorder %v227_v32, %v228_v33 }
 0x328   :  { %v222_v34 = vpop.xlane.xlu1 %221  ;;  %v232_v35 = vsel %vm231_vm14, %v227_v32, %v228_v33 }
 0x329   :  { %vm225_vm15 = vcmp.eq.f32.partialorder %v215_v28, %v222_v34  ;;  %vm226_vm0 = vcmp.eq.f32.partialorder %v216_v29, %v222_v34  ;;  %v234_v37 = vshra.s32 %v232_v35, 16  ;;  %v233_v44 = vand.u32 65535, %v232_v35 }
 0x32a   :  { %v229_v38 = vsel %vm225_vm15, %v1252_v56, 256  ;;  %v230_v39 = vsel %vm226_vm0, %v1255_v57, 256 }
 0x32b   :  { %vm247_vm1 = vcmp.lt.s32.totalorder %v229_v38, %v230_v39  ;;  %v236_v40 = vcvt.s32.f32 %v234_v37  ;;  %v235_v46 = vcvt.s32.f32 %v233_v44 }
 0x32c   :  { %v248_v41 = vsel %vm247_vm1, %v229_v38, %v230_v39 }
 0x32d   :  { %237 = vmin.xlane.f32.xlu0 %v236_v40  ;;  %v250_v42 = vshra.s32 %v248_v41, 16  ;;  %v249_v49 = vand.u32 65535, %v248_v41 }
 0x32f   :  { %v252_v43 = vcvt.s32.f32 %v250_v42  ;;  %v251_v52 = vcvt.s32.f32 %v249_v49 }
 0x331   :  { %253 = vmin.xlane.f32.xlu1 %v252_v43 }
 0x3b6   :  { %v238_v45 = vpop.xlane.xlu0 %237 }
 0x3b7   :  { %vm239_vm2 = vcmp.eq.f32.partialorder %v236_v40, %v238_v45  ;;  %v244_v58 = vcvt.f32.s32 %v238_v45 }
 0x3b8   :  { %v240_v50 = vsel %vm239_vm2, %v235_v46, inf }
 0x3b9   :  { %241 = vmin.xlane.f32.xlu0 %v240_v50  ;;  %v245_v60 = vshll.u32 %v244_v58, 16 }
 0x3ba   :  { %v254_v51 = vpop.xlane.xlu1 %253 }
 0x3bb   :  { %vm255_vm3 = vcmp.eq.f32.partialorder %v252_v43, %v254_v51  ;;  %v260_v61 = vcvt.f32.s32 %v254_v51 }
 0x3bc   :  { %v256_v55 = vsel %vm255_vm3, %v251_v52, inf }
 0x3bd   :  { %257 = vmin.xlane.f32.xlu1 %v256_v55  ;;  %v261_v1 = vshll.u32 %v260_v61, 16 }
 0x442   :  { %v242_v59 = vpop.xlane.xlu0 %241 }
 0x443   :  { %v243_v62 = vcvt.f32.s32 %v242_v59 }
 0x445   :  { %v246_v63 = vadd.s32 %v245_v60, %v243_v62 }
 0x446   :  { %v258_v0 = vpop.xlane.xlu1 %257 }
 0x447   :  { %vm263_vm4 = vcmp.eq.s32.totalorder %v1252_v56, %v246_v63  ;;  %vm264_vm5 = vcmp.eq.s32.totalorder %v1255_v57, %v246_v63  ;;  %v259_v2 = vcvt.f32.s32 %v258_v0 }
 0x448   :  { %v267_v3 = vsel %vm263_vm4, -1e+30, %v213_v24  ;;  %v268_v5 = vsel %vm264_vm5, -1e+30, %v214_v25 }
 0x449   :  { %v262_v6 = vadd.s32 %v261_v1, %v259_v2  ;;  %v271_v7 = vmax.f32 %v267_v3, %v268_v5 }
 0x44b   :  { %vm265_vm6 = vcmp.eq.s32.totalorder %v1252_v56, %v262_v6  ;;  %vm266_vm7 = vcmp.eq.s32.totalorder %v1255_v57, %v262_v6  ;;  %272 = vmax.xlane.f32.xlu0 %v271_v7 }
 0x44c   :  { %v269_v8 = vsel %vm265_vm6, -1e+30, %v215_v28  ;;  %v270_v9 = vsel %vm266_vm7, -1e+30, %v216_v29 }
 0x44d   :  { %v274_v10 = vmax.f32 %v269_v8, %v270_v9 }
 0x44f   :  { %275 = vmax.xlane.f32.xlu1 %v274_v10 }
 0x4d4   :  { %v273_v11 = vpop.xlane.xlu0 %272 }
 0x4d5   :  { %vm277_vm8 = vcmp.eq.f32.partialorder %v267_v3, %v273_v11  ;;  %vm278_vm9 = vcmp.eq.f32.partialorder %v268_v5, %v273_v11 }
 0x4d6   :  { %v281_v12 = vsel %vm277_vm8, %v1252_v56, 256  ;;  %v282_v13 = vsel %vm278_vm9, %v1255_v57, 256 }
 0x4d7   :  { %vm285_vm10 = vcmp.lt.s32.totalorder %v281_v12, %v282_v13 }
 0x4d8   :  { %v276_v14 = vpop.xlane.xlu1 %275  ;;  %v286_v15 = vsel %vm285_vm10, %v281_v12, %v282_v13 }
 0x4d9   :  { %vm279_vm11 = vcmp.eq.f32.partialorder %v269_v8, %v276_v14  ;;  %vm280_vm12 = vcmp.eq.f32.partialorder %v270_v9, %v276_v14  ;;  %v288_v16 = vshra.s32 %v286_v15, 16  ;;  %v287_v23 = vand.u32 65535, %v286_v15 }
 0x4da   :  { %v283_v17 = vsel %vm279_vm11, %v1252_v56, 256  ;;  %v284_v18 = vsel %vm280_vm12, %v1255_v57, 256 }
 0x4db   :  { %vm301_vm13 = vcmp.lt.s32.totalorder %v283_v17, %v284_v18  ;;  %v290_v19 = vcvt.s32.f32 %v288_v16  ;;  %v289_v25 = vcvt.s32.f32 %v287_v23 }
 0x4dc   :  { %v302_v20 = vsel %vm301_vm13, %v283_v17, %v284_v18 }
 0x4dd   :  { %291 = vmin.xlane.f32.xlu0 %v290_v19  ;;  %v304_v21 = vshra.s32 %v302_v20, 16  ;;  %v303_v26 = vand.u32 65535, %v302_v20 }
 0x4df   :  { %v306_v22 = vcvt.s32.f32 %v304_v21  ;;  %v305_v29 = vcvt.s32.f32 %v303_v26 }
 0x4e1   :  { %307 = vmin.xlane.f32.xlu1 %v306_v22 }
 0x566   :  { %v292_v24 = vpop.xlane.xlu0 %291 }
 0x567   :  { %vm293_vm14 = vcmp.eq.f32.partialorder %v290_v19, %v292_v24  ;;  %v298_v31 = vcvt.f32.s32 %v292_v24 }
 0x568   :  { %v294_v27 = vsel %vm293_vm14, %v289_v25, inf }
 0x569   :  { %295 = vmin.xlane.f32.xlu0 %v294_v27  ;;  %v299_v33 = vshll.u32 %v298_v31, 16 }
 0x56a   :  { %v308_v28 = vpop.xlane.xlu1 %307 }
 0x56b   :  { %vm309_vm15 = vcmp.eq.f32.partialorder %v306_v22, %v308_v28  ;;  %v314_v34 = vcvt.f32.s32 %v308_v28 }
 0x56c   :  { %v310_v30 = vsel %vm309_vm15, %v305_v29, inf }
 0x56d   :  { %311 = vmin.xlane.f32.xlu1 %v310_v30  ;;  %v315_v39 = vshll.u32 %v314_v34, 16 }
 0x5f2   :  { %v296_v32 = vpop.xlane.xlu0 %295 }
 0x5f3   :  { %v297_v35 = vcvt.f32.s32 %v296_v32 }
 0x5f5   :  { %v300_v37 = vadd.s32 %v299_v33, %v297_v35 }
 0x5f6   :  { %v312_v38 = vpop.xlane.xlu1 %311 }
 0x5f7   :  { %vm317_vm0 = vcmp.eq.s32.totalorder %v1252_v56, %v300_v37  ;;  %vm318_vm1 = vcmp.eq.s32.totalorder %v1255_v57, %v300_v37  ;;  %v313_v40 = vcvt.f32.s32 %v312_v38 }
 0x5f8   :  { %v321_v41 = vsel %vm317_vm0, -1e+30, %v267_v3  ;;  %v322_v42 = vsel %vm318_vm1, -1e+30, %v268_v5 }
 0x5f9   :  { %v316_v43 = vadd.s32 %v315_v39, %v313_v40  ;;  %v325_v44 = vmax.f32 %v321_v41, %v322_v42 }
 0x5fb   :  { %vm319_vm2 = vcmp.eq.s32.totalorder %v1252_v56, %v316_v43  ;;  %vm320_vm3 = vcmp.eq.s32.totalorder %v1255_v57, %v316_v43  ;;  %326 = vmax.xlane.f32.xlu0 %v325_v44 }
 0x5fc   :  { %v323_v45 = vsel %vm319_vm2, -1e+30, %v269_v8  ;;  %v324_v46 = vsel %vm320_vm3, -1e+30, %v270_v9 }
 0x5fd   :  { %v328_v49 = vmax.f32 %v323_v45, %v324_v46 }
 0x5ff   :  { %329 = vmax.xlane.f32.xlu1 %v328_v49 }
 0x684   :  { %v327_v50 = vpop.xlane.xlu0 %326 }
 0x685   :  { %vm331_vm4 = vcmp.eq.f32.partialorder %v321_v41, %v327_v50  ;;  %vm332_vm5 = vcmp.eq.f32.partialorder %v322_v42, %v327_v50 }
 0x686   :  { %v335_v51 = vsel %vm331_vm4, %v1252_v56, 256  ;;  %v336_v52 = vsel %vm332_vm5, %v1255_v57, 256 }
 0x687   :  { %vm339_vm6 = vcmp.lt.s32.totalorder %v335_v51, %v336_v52 }
 0x688   :  { %v330_v55 = vpop.xlane.xlu1 %329  ;;  %v340_v58 = vsel %vm339_vm6, %v335_v51, %v336_v52 }
 0x689   :  { %vm333_vm7 = vcmp.eq.f32.partialorder %v323_v45, %v330_v55  ;;  %vm334_vm8 = vcmp.eq.f32.partialorder %v324_v46, %v330_v55  ;;  %v342_v59 = vshra.s32 %v340_v58, 16  ;;  %v341_v2 = vand.u32 65535, %v340_v58 }
 0x68a   :  { %v337_v60 = vsel %vm333_vm7, %v1252_v56, 256  ;;  %v338_v61 = vsel %vm334_vm8, %v1255_v57, 256 }
 0x68b   :  { %vm355_vm9 = vcmp.lt.s32.totalorder %v337_v60, %v338_v61  ;;  %v344_v62 = vcvt.s32.f32 %v342_v59  ;;  %v343_v5 = vcvt.s32.f32 %v341_v2 }
 0x68c   :  { %v356_v63 = vsel %vm355_vm9, %v337_v60, %v338_v61 }
 0x68d   :  { %345 = vmin.xlane.f32.xlu0 %v344_v62  ;;  %v358_v0 = vshra.s32 %v356_v63, 16  ;;  %v357_v6 = vand.u32 65535, %v356_v63 }
 0x68f   :  { %v360_v1 = vcvt.s32.f32 %v358_v0  ;;  %v359_v9 = vcvt.s32.f32 %v357_v6 }
 0x691   :  { %361 = vmin.xlane.f32.xlu1 %v360_v1 }
 0x716   :  { %v346_v3 = vpop.xlane.xlu0 %345 }
 0x717   :  { %vm347_vm10 = vcmp.eq.f32.partialorder %v344_v62, %v346_v3  ;;  %v352_v11 = vcvt.f32.s32 %v346_v3 }
 0x718   :  { %v348_v7 = vsel %vm347_vm10, %v343_v5, inf }
 0x719   :  { %349 = vmin.xlane.f32.xlu0 %v348_v7  ;;  %v353_v13 = vshll.u32 %v352_v11, 16 }
 0x71a   :  { %v362_v8 = vpop.xlane.xlu1 %361 }
 0x71b   :  { %vm363_vm11 = vcmp.eq.f32.partialorder %v360_v1, %v362_v8  ;;  %v368_v14 = vcvt.f32.s32 %v362_v8 }
 0x71c   :  { %v364_v10 = vsel %vm363_vm11, %v359_v9, inf }
 0x71d   :  { %365 = vmin.xlane.f32.xlu1 %v364_v10  ;;  %v369_v18 = vshll.u32 %v368_v14, 16 }
 0x7a2   :  { %v350_v12 = vpop.xlane.xlu0 %349 }
 0x7a3   :  { %v351_v15 = vcvt.f32.s32 %v350_v12 }
 0x7a5   :  { %v354_v16 = vadd.s32 %v353_v13, %v351_v15 }
 0x7a6   :  { %v366_v17 = vpop.xlane.xlu1 %365 }
 0x7a7   :  { %vm371_vm12 = vcmp.eq.s32.totalorder %v1252_v56, %v354_v16  ;;  %vm372_vm13 = vcmp.eq.s32.totalorder %v1255_v57, %v354_v16  ;;  %v367_v19 = vcvt.f32.s32 %v366_v17 }
 0x7a8   :  { %v375_v20 = vsel %vm371_vm12, -1e+30, %v321_v41  ;;  %v376_v21 = vsel %vm372_vm13, -1e+30, %v322_v42 }
 0x7a9   :  { %v370_v22 = vadd.s32 %v369_v18, %v367_v19  ;;  %v379_v23 = vmax.f32 %v375_v20, %v376_v21 }
 0x7ab   :  { %vm373_vm14 = vcmp.eq.s32.totalorder %v1252_v56, %v370_v22  ;;  %vm374_vm15 = vcmp.eq.s32.totalorder %v1255_v57, %v370_v22  ;;  %380 = vmax.xlane.f32.xlu0 %v379_v23 }
 0x7ac   :  { %v377_v24 = vsel %vm373_vm14, -1e+30, %v323_v45  ;;  %v378_v25 = vsel %vm374_vm15, -1e+30, %v324_v46 }
 0x7ad   :  { %v382_v26 = vmax.f32 %v377_v24, %v378_v25 }
 0x7af   :  { %383 = vmax.xlane.f32.xlu1 %v382_v26 }
 0x834   :  { %v381_v27 = vpop.xlane.xlu0 %380 }
 0x835   :  { %vm385_vm0 = vcmp.eq.f32.partialorder %v375_v20, %v381_v27  ;;  %vm386_vm1 = vcmp.eq.f32.partialorder %v376_v21, %v381_v27 }
 0x836   :  { %v389_v28 = vsel %vm385_vm0, %v1252_v56, 256  ;;  %v390_v29 = vsel %vm386_vm1, %v1255_v57, 256 }
 0x837   :  { %vm393_vm2 = vcmp.lt.s32.totalorder %v389_v28, %v390_v29 }
 0x838   :  { %v384_v30 = vpop.xlane.xlu1 %383  ;;  %v394_v31 = vsel %vm393_vm2, %v389_v28, %v390_v29 }
 0x839   :  { %vm387_vm3 = vcmp.eq.f32.partialorder %v377_v24, %v384_v30  ;;  %vm388_vm4 = vcmp.eq.f32.partialorder %v378_v25, %v384_v30  ;;  %v396_v32 = vshra.s32 %v394_v31, 16  ;;  %v395_v40 = vand.u32 65535, %v394_v31 }
 0x83a   :  { %v391_v33 = vsel %vm387_vm3, %v1252_v56, 256  ;;  %v392_v34 = vsel %vm388_vm4, %v1255_v57, 256 }
 0x83b   :  { %vm409_vm5 = vcmp.lt.s32.totalorder %v391_v33, %v392_v34  ;;  %v398_v35 = vcvt.s32.f32 %v396_v32  ;;  %v397_v42 = vcvt.s32.f32 %v395_v40 }
 0x83c   :  { %v410_v37 = vsel %vm409_vm5, %v391_v33, %v392_v34 }
 0x83d   :  { %399 = vmin.xlane.f32.xlu0 %v398_v35  ;;  %v412_v38 = vshra.s32 %v410_v37, 16  ;;  %v411_v43 = vand.u32 65535, %v410_v37 }
 0x83f   :  { %v414_v39 = vcvt.s32.f32 %v412_v38  ;;  %v413_v46 = vcvt.s32.f32 %v411_v43 }
 0x841   :  { %415 = vmin.xlane.f32.xlu1 %v414_v39 }
 0x8c6   :  { %v400_v41 = vpop.xlane.xlu0 %399 }
 0x8c7   :  { %vm401_vm6 = vcmp.eq.f32.partialorder %v398_v35, %v400_v41  ;;  %v406_v50 = vcvt.f32.s32 %v400_v41 }
 0x8c8   :  { %v402_v44 = vsel %vm401_vm6, %v397_v42, inf }
 0x8c9   :  { %403 = vmin.xlane.f32.xlu0 %v402_v44  ;;  %v407_v52 = vshll.u32 %v406_v50, 16 }
 0x8ca   :  { %v416_v45 = vpop.xlane.xlu1 %415 }
 0x8cb   :  { %vm417_vm7 = vcmp.eq.f32.partialorder %v414_v39, %v416_v45  ;;  %v422_v55 = vcvt.f32.s32 %v416_v45 }
 0x8cc   :  { %v418_v49 = vsel %vm417_vm7, %v413_v46, inf }
 0x8cd   :  { %419 = vmin.xlane.f32.xlu1 %v418_v49  ;;  %v423_v61 = vshll.u32 %v422_v55, 16 }
 0x952   :  { %v404_v51 = vpop.xlane.xlu0 %403 }
 0x953   :  { %v405_v58 = vcvt.f32.s32 %v404_v51 }
 0x955   :  { %v408_v59 = vadd.s32 %v407_v52, %v405_v58 }
 0x956   :  { %v420_v60 = vpop.xlane.xlu1 %419 }
 0x957   :  { %vm425_vm8 = vcmp.eq.s32.totalorder %v1252_v56, %v408_v59  ;;  %vm426_vm9 = vcmp.eq.s32.totalorder %v1255_v57, %v408_v59  ;;  %v421_v62 = vcvt.f32.s32 %v420_v60 }
 0x958   :  { %v429_v63 = vsel %vm425_vm8, -1e+30, %v375_v20  ;;  %v430_v0 = vsel %vm426_vm9, -1e+30, %v376_v21 }
 0x959   :  { %v424_v1 = vadd.s32 %v423_v61, %v421_v62  ;;  %v433_v2 = vmax.f32 %v429_v63, %v430_v0 }
 0x95b   :  { %vm427_vm10 = vcmp.eq.s32.totalorder %v1252_v56, %v424_v1  ;;  %vm428_vm11 = vcmp.eq.s32.totalorder %v1255_v57, %v424_v1  ;;  %434 = vmax.xlane.f32.xlu0 %v433_v2 }
 0x95c   :  { %v431_v3 = vsel %vm427_vm10, -1e+30, %v377_v24  ;;  %v432_v5 = vsel %vm428_vm11, -1e+30, %v378_v25 }
 0x95d   :  { %v436_v6 = vmax.f32 %v431_v3, %v432_v5 }
 0x95f   :  { %437 = vmax.xlane.f32.xlu1 %v436_v6 }
 0x9e4   :  { %v435_v7 = vpop.xlane.xlu0 %434 }
 0x9e5   :  { %vm439_vm12 = vcmp.eq.f32.partialorder %v429_v63, %v435_v7  ;;  %vm440_vm13 = vcmp.eq.f32.partialorder %v430_v0, %v435_v7 }
 0x9e6   :  { %v443_v8 = vsel %vm439_vm12, %v1252_v56, 256  ;;  %v444_v9 = vsel %vm440_vm13, %v1255_v57, 256 }
 0x9e7   :  { %vm447_vm14 = vcmp.lt.s32.totalorder %v443_v8, %v444_v9 }
 0x9e8   :  { %v438_v10 = vpop.xlane.xlu1 %437  ;;  %v448_v11 = vsel %vm447_vm14, %v443_v8, %v444_v9 }
 0x9e9   :  { %vm441_vm15 = vcmp.eq.f32.partialorder %v431_v3, %v438_v10  ;;  %vm442_vm0 = vcmp.eq.f32.partialorder %v432_v5, %v438_v10  ;;  %v450_v12 = vshra.s32 %v448_v11, 16  ;;  %v449_v19 = vand.u32 65535, %v448_v11 }
 0x9ea   :  { %v445_v13 = vsel %vm441_vm15, %v1252_v56, 256  ;;  %v446_v14 = vsel %vm442_vm0, %v1255_v57, 256 }
 0x9eb   :  { %vm463_vm1 = vcmp.lt.s32.totalorder %v445_v13, %v446_v14  ;;  %v452_v15 = vcvt.s32.f32 %v450_v12  ;;  %v451_v21 = vcvt.s32.f32 %v449_v19 }
 0x9ec   :  { %v464_v16 = vsel %vm463_vm1, %v445_v13, %v446_v14 }
 0x9ed   :  { %453 = vmin.xlane.f32.xlu0 %v452_v15  ;;  %v466_v17 = vshra.s32 %v464_v16, 16  ;;  %v465_v22 = vand.u32 65535, %v464_v16 }
 0x9ef   :  { %v468_v18 = vcvt.s32.f32 %v466_v17  ;;  %v467_v25 = vcvt.s32.f32 %v465_v22 }
 0x9f1   :  { %469 = vmin.xlane.f32.xlu1 %v468_v18 }
 0xa76   :  { %v454_v20 = vpop.xlane.xlu0 %453 }
 0xa77   :  { %vm455_vm2 = vcmp.eq.f32.partialorder %v452_v15, %v454_v20  ;;  %v460_v27 = vcvt.f32.s32 %v454_v20 }
 0xa78   :  { %v456_v23 = vsel %vm455_vm2, %v451_v21, inf }
 0xa79   :  { %457 = vmin.xlane.f32.xlu0 %v456_v23  ;;  %v461_v29 = vshll.u32 %v460_v27, 16 }
 0xa7a   :  { %v470_v24 = vpop.xlane.xlu1 %469 }
 0xa7b   :  { %vm471_vm3 = vcmp.eq.f32.partialorder %v468_v18, %v470_v24  ;;  %v476_v30 = vcvt.f32.s32 %v470_v24 }
 0xa7c   :  { %v472_v26 = vsel %vm471_vm3, %v467_v25, inf }
 0xa7d   :  { %473 = vmin.xlane.f32.xlu1 %v472_v26  ;;  %v477_v34 = vshll.u32 %v476_v30, 16 }
 0xb02   :  { %v458_v28 = vpop.xlane.xlu0 %457 }
 0xb03   :  { %v459_v31 = vcvt.f32.s32 %v458_v28 }
 0xb05   :  { %v462_v32 = vadd.s32 %v461_v29, %v459_v31 }
 0xb06   :  { %v474_v33 = vpop.xlane.xlu1 %473 }
 0xb07   :  { %vm479_vm4 = vcmp.eq.s32.totalorder %v1252_v56, %v462_v32  ;;  %vm480_vm5 = vcmp.eq.s32.totalorder %v1255_v57, %v462_v32  ;;  %v475_v35 = vcvt.f32.s32 %v474_v33 }
 0xb08   :  { %v483_v37 = vsel %vm479_vm4, -1e+30, %v429_v63  ;;  %v484_v38 = vsel %vm480_vm5, -1e+30, %v430_v0 }
 0xb09   :  { %v478_v39 = vadd.s32 %v477_v34, %v475_v35  ;;  %v487_v40 = vmax.f32 %v483_v37, %v484_v38 }
 0xb0b   :  { %vm481_vm6 = vcmp.eq.s32.totalorder %v1252_v56, %v478_v39  ;;  %vm482_vm7 = vcmp.eq.s32.totalorder %v1255_v57, %v478_v39  ;;  %488 = vmax.xlane.f32.xlu0 %v487_v40 }
 0xb0c   :  { %v485_v41 = vsel %vm481_vm6, -1e+30, %v431_v3  ;;  %v486_v42 = vsel %vm482_vm7, -1e+30, %v432_v5 }
 0xb0d   :  { %v490_v43 = vmax.f32 %v485_v41, %v486_v42 }
 0xb0f   :  { %491 = vmax.xlane.f32.xlu1 %v490_v43 }
 0xb94   :  { %v489_v44 = vpop.xlane.xlu0 %488 }
 0xb95   :  { %vm493_vm8 = vcmp.eq.f32.partialorder %v483_v37, %v489_v44  ;;  %vm494_vm9 = vcmp.eq.f32.partialorder %v484_v38, %v489_v44 }
 0xb96   :  { %v497_v45 = vsel %vm493_vm8, %v1252_v56, 256  ;;  %v498_v46 = vsel %vm494_vm9, %v1255_v57, 256 }
 0xb97   :  { %vm501_vm10 = vcmp.lt.s32.totalorder %v497_v45, %v498_v46 }
 0xb98   :  { %v492_v49 = vpop.xlane.xlu1 %491  ;;  %v502_v50 = vsel %vm501_vm10, %v497_v45, %v498_v46 }
 0xb99   :  { %vm495_vm11 = vcmp.eq.f32.partialorder %v485_v41, %v492_v49  ;;  %vm496_vm12 = vcmp.eq.f32.partialorder %v486_v42, %v492_v49  ;;  %v504_v51 = vshra.s32 %v502_v50, 16  ;;  %v503_v62 = vand.u32 65535, %v502_v50 }
 0xb9a   :  { %v499_v52 = vsel %vm495_vm11, %v1252_v56, 256  ;;  %v500_v55 = vsel %vm496_vm12, %v1255_v57, 256 }
 0xb9b   :  { %vm517_vm13 = vcmp.lt.s32.totalorder %v499_v52, %v500_v55  ;;  %v506_v58 = vcvt.s32.f32 %v504_v51  ;;  %v505_v0 = vcvt.s32.f32 %v503_v62 }
 0xb9c   :  { %v518_v59 = vsel %vm517_vm13, %v499_v52, %v500_v55 }
 0xb9d   :  { %507 = vmin.xlane.f32.xlu0 %v506_v58  ;;  %v520_v60 = vshra.s32 %v518_v59, 16  ;;  %v519_v1 = vand.u32 65535, %v518_v59 }
 0xb9f   :  { %v522_v61 = vcvt.s32.f32 %v520_v60  ;;  %v521_v5 = vcvt.s32.f32 %v519_v1 }
 0xba1   :  { %523 = vmin.xlane.f32.xlu1 %v522_v61 }
 0xc26   :  { %v508_v63 = vpop.xlane.xlu0 %507 }
 0xc27   :  { %vm509_vm14 = vcmp.eq.f32.partialorder %v506_v58, %v508_v63  ;;  %v514_v7 = vcvt.f32.s32 %v508_v63 }
 0xc28   :  { %v510_v2 = vsel %vm509_vm14, %v505_v0, inf }
 0xc29   :  { %511 = vmin.xlane.f32.xlu0 %v510_v2  ;;  %v515_v9 = vshll.u32 %v514_v7, 16 }
 0xc2a   :  { %v524_v3 = vpop.xlane.xlu1 %523 }
 0xc2b   :  { %vm525_vm15 = vcmp.eq.f32.partialorder %v522_v61, %v524_v3  ;;  %v530_v10 = vcvt.f32.s32 %v524_v3 }
 0xc2c   :  { %v526_v6 = vsel %vm525_vm15, %v521_v5, inf }
 0xc2d   :  { %527 = vmin.xlane.f32.xlu1 %v526_v6  ;;  %v531_v14 = vshll.u32 %v530_v10, 16 }
 0xcb2   :  { %v512_v8 = vpop.xlane.xlu0 %511 }
 0xcb3   :  { %v513_v11 = vcvt.f32.s32 %v512_v8 }
 0xcb5   :  { %v516_v12 = vadd.s32 %v515_v9, %v513_v11 }
 0xcb6   :  { %v528_v13 = vpop.xlane.xlu1 %527 }
 0xcb7   :  { %vm533_vm0 = vcmp.eq.s32.totalorder %v1252_v56, %v516_v12  ;;  %vm534_vm1 = vcmp.eq.s32.totalorder %v1255_v57, %v516_v12  ;;  %v529_v15 = vcvt.f32.s32 %v528_v13 }
 0xcb8   :  { %v537_v16 = vsel %vm533_vm0, -1e+30, %v483_v37  ;;  %v538_v17 = vsel %vm534_vm1, -1e+30, %v484_v38 }
 0xcb9   :  { %v532_v18 = vadd.s32 %v531_v14, %v529_v15  ;;  %v541_v19 = vmax.f32 %v537_v16, %v538_v17 }
 0xcbb   :  { %vm535_vm2 = vcmp.eq.s32.totalorder %v1252_v56, %v532_v18  ;;  %vm536_vm3 = vcmp.eq.s32.totalorder %v1255_v57, %v532_v18  ;;  %542 = vmax.xlane.f32.xlu0 %v541_v19 }
 0xcbc   :  { %v539_v20 = vsel %vm535_vm2, -1e+30, %v485_v41  ;;  %v540_v21 = vsel %vm536_vm3, -1e+30, %v486_v42 }
 0xcbd   :  { %v544_v22 = vmax.f32 %v539_v20, %v540_v21 }
 0xcbf   :  { %545 = vmax.xlane.f32.xlu1 %v544_v22 }
 0xd44   :  { %v543_v23 = vpop.xlane.xlu0 %542 }
 0xd45   :  { %vm547_vm4 = vcmp.eq.f32.partialorder %v537_v16, %v543_v23  ;;  %vm548_vm5 = vcmp.eq.f32.partialorder %v538_v17, %v543_v23 }
 0xd46   :  { %v551_v24 = vsel %vm547_vm4, %v1252_v56, 256  ;;  %v552_v25 = vsel %vm548_vm5, %v1255_v57, 256 }
 0xd47   :  { %vm555_vm6 = vcmp.lt.s32.totalorder %v551_v24, %v552_v25 }
 0xd48   :  { %v546_v26 = vpop.xlane.xlu1 %545  ;;  %v556_v27 = vsel %vm555_vm6, %v551_v24, %v552_v25 }
 0xd49   :  { %vm549_vm7 = vcmp.eq.f32.partialorder %v539_v20, %v546_v26  ;;  %vm550_vm8 = vcmp.eq.f32.partialorder %v540_v21, %v546_v26  ;;  %v558_v28 = vshra.s32 %v556_v27, 16  ;;  %v557_v35 = vand.u32 65535, %v556_v27 }
 0xd4a   :  { %v553_v29 = vsel %vm549_vm7, %v1252_v56, 256  ;;  %v554_v30 = vsel %vm550_vm8, %v1255_v57, 256 }
 0xd4b   :  { %vm571_vm9 = vcmp.lt.s32.totalorder %v553_v29, %v554_v30  ;;  %v560_v31 = vcvt.s32.f32 %v558_v28  ;;  %v559_v38 = vcvt.s32.f32 %v557_v35 }
 0xd4c   :  { %v572_v32 = vsel %vm571_vm9, %v553_v29, %v554_v30 }
 0xd4d   :  { %561 = vmin.xlane.f32.xlu0 %v560_v31  ;;  %v574_v33 = vshra.s32 %v572_v32, 16  ;;  %v573_v39 = vand.u32 65535, %v572_v32 }
 0xd4f   :  { %v576_v34 = vcvt.s32.f32 %v574_v33  ;;  %v575_v42 = vcvt.s32.f32 %v573_v39 }
 0xd51   :  { %577 = vmin.xlane.f32.xlu1 %v576_v34 }
 0xdd6   :  { %v562_v37 = vpop.xlane.xlu0 %561 }
 0xdd7   :  { %vm563_vm10 = vcmp.eq.f32.partialorder %v560_v31, %v562_v37  ;;  %v568_v44 = vcvt.f32.s32 %v562_v37 }
 0xdd8   :  { %v564_v40 = vsel %vm563_vm10, %v559_v38, inf }
 0xdd9   :  { %565 = vmin.xlane.f32.xlu0 %v564_v40  ;;  %v569_v46 = vshll.u32 %v568_v44, 16 }
 0xdda   :  { %v578_v41 = vpop.xlane.xlu1 %577 }
 0xddb   :  { %vm579_vm11 = vcmp.eq.f32.partialorder %v576_v34, %v578_v41  ;;  %v584_v49 = vcvt.f32.s32 %v578_v41 }
 0xddc   :  { %v580_v43 = vsel %vm579_vm11, %v575_v42, inf }
 0xddd   :  { %581 = vmin.xlane.f32.xlu1 %v580_v43  ;;  %v585_v55 = vshll.u32 %v584_v49, 16 }
 0xe62   :  { %v566_v45 = vpop.xlane.xlu0 %565 }
 0xe63   :  { %v567_v50 = vcvt.f32.s32 %v566_v45 }
 0xe65   :  { %v570_v51 = vadd.s32 %v569_v46, %v567_v50 }
 0xe66   :  { %v582_v52 = vpop.xlane.xlu1 %581 }
 0xe67   :  { %vm587_vm12 = vcmp.eq.s32.totalorder %v1252_v56, %v570_v51  ;;  %vm588_vm13 = vcmp.eq.s32.totalorder %v1255_v57, %v570_v51  ;;  %v583_v58 = vcvt.f32.s32 %v582_v52 }
 0xe68   :  { %v591_v59 = vsel %vm587_vm12, -1e+30, %v537_v16  ;;  %v592_v60 = vsel %vm588_vm13, -1e+30, %v538_v17 }
 0xe69   :  { %v586_v61 = vadd.s32 %v585_v55, %v583_v58  ;;  %v595_v62 = vmax.f32 %v591_v59, %v592_v60  ;;  %v750_v58 = vld [vmem:[%s1506_s3 + $0xf8] sm:$0xff] }
 0xe6a   :  { %981 = vmatprep.subr.mxu1 %v750_v58 }
 0xe6b   :  { %vm589_vm14 = vcmp.eq.s32.totalorder %v1252_v56, %v586_v61  ;;  %vm590_vm15 = vcmp.eq.s32.totalorder %v1255_v57, %v586_v61  ;;  %596 = vmax.xlane.f32.xlu0 %v595_v62  ;;  %v733_v61 = vld [vmem:[%s1506_s3 + $0x70] sm:$0xff]  ;;  %v748_v62 = vld [vmem:[%s1506_s3 + $0xe8] sm:$0xff] }
 0xe6c   :  { %v593_v63 = vsel %vm589_vm14, -1e+30, %v539_v20  ;;  %v594_v0 = vsel %vm590_vm15, -1e+30, %v540_v21 }
 0xe6d   :  { %v598_v1 = vmax.f32 %v593_v63, %v594_v0 }
 0xe6f   :  { %599 = vmax.xlane.f32.xlu1 %v598_v1  ;;  %v731_v1 = vld [vmem:[%s1506_s3 + $0x60] sm:$0xff] }
 0xef4   :  { %v597_v2 = vpop.xlane.xlu0 %596 }
 0xef5   :  { %vm601_vm0 = vcmp.eq.f32.partialorder %v591_v59, %v597_v2  ;;  %vm602_vm1 = vcmp.eq.f32.partialorder %v592_v60, %v597_v2  ;;  %v746_v2 = vld [vmem:[%s1506_s3 + $0xd8] sm:$0xff] }
 0xef6   :  { %v605_v3 = vsel %vm601_vm0, %v1252_v56, 256  ;;  %v606_v5 = vsel %vm602_vm1, %v1255_v57, 256 }
 0xef7   :  { %vm609_vm2 = vcmp.lt.s32.totalorder %v605_v3, %v606_v5 }
 0xef8   :  { %v600_v6 = vpop.xlane.xlu1 %599  ;;  %v610_v7 = vsel %vm609_vm2, %v605_v3, %v606_v5  ;;  %v730_v3 = vld [vmem:[%s1506_s3 + $0x58] sm:$0xff]  ;;  %v745_v5 = vld [vmem:[%s1506_s3 + $0xd0] sm:$0xff] }
 0xef9   :  { %vm603_vm3 = vcmp.eq.f32.partialorder %v593_v63, %v600_v6  ;;  %vm604_vm4 = vcmp.eq.f32.partialorder %v594_v0, %v600_v6  ;;  %v612_v8 = vshra.s32 %v610_v7, 16  ;;  %v611_v15 = vand.u32 65535, %v610_v7  ;;  %v729_v6 = vld [vmem:[%s1506_s3 + $0x50] sm:$0xff]  ;;  %v744_v7 = vld [vmem:[%s1506_s3 + $0xc8] sm:$0xff] }
 0xefa   :  { %v607_v9 = vsel %vm603_vm3, %v1252_v56, 256  ;;  %v608_v10 = vsel %vm604_vm4, %v1255_v57, 256 }
 0xefb   :  { %vm625_vm5 = vcmp.lt.s32.totalorder %v607_v9, %v608_v10  ;;  %v614_v11 = vcvt.s32.f32 %v612_v8  ;;  %v613_v17 = vcvt.s32.f32 %v611_v15  ;;  %v728_v8 = vld [vmem:[%s1506_s3 + $0x48] sm:$0xff] }
 0xefc   :  { %v626_v12 = vsel %vm625_vm5, %v607_v9, %v608_v10  ;;  %v743_v9 = vld [vmem:[%s1506_s3 + $0xc0] sm:$0xff] }
 0xefd   :  { %615 = vmin.xlane.f32.xlu0 %v614_v11  ;;  %v628_v13 = vshra.s32 %v626_v12, 16  ;;  %v627_v18 = vand.u32 65535, %v626_v12 }
 0xeff   :  { %v630_v14 = vcvt.s32.f32 %v628_v13  ;;  %v629_v21 = vcvt.s32.f32 %v627_v18  ;;  %v742_v18 = vld [vmem:[%s1506_s3 + $0xb8] sm:$0xff] }
 0xf01   :  { %631 = vmin.xlane.f32.xlu1 %v630_v14 }
 0xf86   :  { %v616_v16 = vpop.xlane.xlu0 %615 }
 0xf87   :  { %vm617_vm6 = vcmp.eq.f32.partialorder %v614_v11, %v616_v16  ;;  %v622_v23 = vcvt.f32.s32 %v616_v16 }
 0xf88   :  { %v618_v19 = vsel %vm617_vm6, %v613_v17, inf  ;;  %v727_v17 = vld [vmem:[%s1506_s3 + $0x40] sm:$0xff] }
 0xf89   :  { %619 = vmin.xlane.f32.xlu0 %v618_v19  ;;  %v623_v25 = vshll.u32 %v622_v23, 16  ;;  %v740_v23 = vld [vmem:[%s1506_s3 + $0xa8] sm:$0xff] }
 0xf8a   :  { %v632_v20 = vpop.xlane.xlu1 %631 }
 0xf8b   :  { %vm633_vm7 = vcmp.eq.f32.partialorder %v630_v14, %v632_v20  ;;  %v638_v26 = vcvt.f32.s32 %v632_v20  ;;  %v726_v20 = vld [vmem:[%s1506_s3 + $0x38] sm:$0xff] }
 0xf8c   :  { %v634_v22 = vsel %vm633_vm7, %v629_v21, inf  ;;  %v741_v21 = vld [vmem:[%s1506_s3 + $0xb0] sm:$0xff] }
 0xf8d   :  { %635 = vmin.xlane.f32.xlu1 %v634_v22  ;;  %v639_v30 = vshll.u32 %v638_v26, 16  ;;  %v725_v22 = vld [vmem:[%s1506_s3 + $0x30] sm:$0xff]  ;;  %v723_v26 = vld [vmem:[%s1506_s3 + $0x20] sm:$0xff] }
0x1012   :  { %v620_v24 = vpop.xlane.xlu0 %619 }
0x1013   :  { %v621_v27 = vcvt.f32.s32 %v620_v24  ;;  %v724_v24 = vld [vmem:[%s1506_s3 + $0x28] sm:$0xff] }
0x1015   :  { %v624_v28 = vadd.s32 %v623_v25, %v621_v27  ;;  %v739_v25 = vld [vmem:[%s1506_s3 + $0xa0] sm:$0xff]  ;;  %v738_v27 = vld [vmem:[%s1506_s3 + $0x98] sm:$0xff] }
0x1016   :  { %v636_v29 = vpop.xlane.xlu1 %635 }
0x1017   :  { %vm641_vm8 = vcmp.eq.s32.totalorder %v1252_v56, %v624_v28  ;;  %vm642_vm9 = vcmp.eq.s32.totalorder %v1255_v57, %v624_v28  ;;  %v637_v31 = vcvt.f32.s32 %v636_v29  ;;  %v722_v28 = vld [vmem:[%s1506_s3 + $0x18] sm:$0xff]  ;;  %v737_v29 = vld [vmem:[%s1506_s3 + $0x90] sm:$0xff] }
0x1018   :  { %v1335_v32 = vsel %vm641_vm8, -1e+30, %v591_v59  ;;  %v1337_v33 = vsel %vm642_vm9, -1e+30, %v592_v60  ;;  %v734_v59 = vld [vmem:[%s1506_s3 + $0x78] sm:$0xff]  ;;  %v749_v60 = vld [vmem:[%s1506_s3 + $0xf0] sm:$0xff] }
0x1019   :  { %v640_v34 = vadd.s32 %v639_v30, %v637_v31  ;;  %v649_v35 = vmax.f32 %v1335_v32, %v1337_v33  ;;  %982 = vmatpush3.msra.mxu1 %v734_v59  ;;  %v721_v30 = vld [vmem:[%s1506_s3 + $0x10] sm:$0xff]  ;;  %v736_v31 = vld [vmem:[%s1506_s3 + $0x88] sm:$0xff] }
0x101a   :  { %983 = vmatprep.subr.mxu1 %v749_v60 }
0x101b   :  { %vm643_vm10 = vcmp.eq.s32.totalorder %v1252_v56, %v640_v34  ;;  %vm644_vm11 = vcmp.eq.s32.totalorder %v1255_v57, %v640_v34  ;;  %650 = vmax.xlane.f32.xlu0 %v649_v35  ;;  %984 = vmatpush3.msra.mxu1 %v733_v61  ;;  %v720_v34 = vld [vmem:[%s1506_s3 + $0x8] sm:$0xff]  ;;  %v735_v35 = vld [vmem:[%s1506_s3 + $0x80] sm:$0xff] }
0x101c   :  { %v1343_v37 = vsel %vm643_vm10, -1e+30, %v593_v63  ;;  %v1345_v38 = vsel %vm644_vm11, -1e+30, %v594_v0  ;;  %v732_v63 = vld [vmem:[%s1506_s3 + $0x68] sm:$0xff]  ;;  %v747_v0 = vld [vmem:[%s1506_s3 + $0xe0] sm:$0xff]  ;;  %985 = vmatprep.subr.mxu1 %v748_v62 }
0x101d   :  { %v652_v39 = vmax.f32 %v1343_v37, %v1345_v38  ;;  %986 = vmatpush3.msra.mxu1 %v732_v63 }
0x101e   :  { %987 = vmatprep.subr.mxu1 %v747_v0 }
0x101f   :  { %653 = vmax.xlane.f32.xlu1 %v652_v39  ;;  %988 = vmatpush3.msra.mxu1 %v731_v1  ;;  %v719_v39 = vld [vmem:[%s1506_s3] sm:$0xff]  ;;  %v837_v1 = vadd.s32 8, %v1233_v36 }
0x1020   :  { %989 = vmatprep.subr.mxu1 %v746_v2 }
0x1021   :  { %990 = vmatpush3.msra.mxu1 %v730_v3 }
0x1022   :  { %991 = vmatprep.subr.mxu1 %v745_v5 }
0x1023   :  { %992 = vmatpush3.msra.mxu1 %v729_v6 }
0x1024   :  { %993 = vmatprep.subr.mxu1 %v744_v7 }
0x1025   :  { %994 = vmatpush3.msra.mxu1 %v728_v8 }
0x1026   :  { %995 = vmatprep.subr.mxu1 %v743_v9  ;;  %v975_v9 = vld [vmem:[%s1507_s4] ss:$0 sm:$0xff] }
0x1027   :  { %996 = vmatpush3.msra.mxu1 %v727_v17 }
0x1028   :  { %997 = vmatprep.subr.mxu1 %v742_v18 }
0x1029   :  { %998 = vmatpush3.msra.mxu1 %v726_v20 }
0x102a   :  { %999 = vmatprep.subr.mxu1 %v741_v21 }
0x102b   :  { %1000 = vmatpush3.msra.mxu1 %v725_v22 }
0x102c   :  { %1001 = vmatprep.subr.mxu1 %v740_v23 }
0x102d   :  { %1002 = vmatpush3.msra.mxu1 %v724_v24 }
0x102e   :  { %1003 = vmatprep.subr.mxu1 %v739_v25 }
0x102f   :  { %1004 = vmatpush3.msra.mxu1 %v723_v26 }
0x1030   :  { %1005 = vmatprep.subr.mxu1 %v738_v27 }
0x1031   :  { %1006 = vmatpush3.msra.mxu1 %v722_v28 }
0x1032   :  { %1007 = vmatprep.subr.mxu1 %v737_v29 }
0x1033   :  { %1008 = vmatpush3.msra.mxu1 %v721_v30 }
0x1034   :  { %1009 = vmatprep.subr.mxu1 %v736_v31 }
0x1035   :  { %1010 = vmatpush3.msra.mxu1 %v720_v34 }
0x1036   :  { %1011 = vmatprep.subr.mxu1 %v735_v35 }
0x1037   :  { %1012 = vmatpush3.msra.mxu1 %v719_v39 }
0x10a4   :  { %v651_v40 = vpop.xlane.xlu0 %650 }
0x10a5   :  { %vm655_vm12 = vcmp.eq.f32.partialorder %v1335_v32, %v651_v40  ;;  %vm656_vm13 = vcmp.eq.f32.partialorder %v1337_v33, %v651_v40 }
0x10a6   :  { %v659_v41 = vsel %vm655_vm12, %v1252_v56, 256  ;;  %v660_v42 = vsel %vm656_vm13, %v1255_v57, 256 }
0x10a7   :  { %vm663_vm14 = vcmp.lt.s32.totalorder %v659_v41, %v660_v42 }
0x10a8   :  { %v654_v43 = vpop.xlane.xlu1 %653  ;;  %v664_v44 = vsel %vm663_vm14, %v659_v41, %v660_v42 }
0x10a9   :  { %vm657_vm15 = vcmp.eq.f32.partialorder %v1343_v37, %v654_v43  ;;  %vm658_vm0 = vcmp.eq.f32.partialorder %v1345_v38, %v654_v43  ;;  %v666_v45 = vshra.s32 %v664_v44, 16  ;;  %v665_v10 = vand.u32 65535, %v664_v44 }
0x10aa   :  { %v661_v46 = vsel %vm657_vm15, %v1252_v56, 256  ;;  %v662_v49 = vsel %vm658_vm0, %v1255_v57, 256  ;;  %vm843_vm0 = vcmp.lt.s32.totalorder %v837_v1, 12 }
0x10ab   :  { %vm679_vm1 = vcmp.lt.s32.totalorder %v661_v46, %v662_v49  ;;  %v668_v50 = vcvt.s32.f32 %v666_v45  ;;  %v667_v12 = vcvt.s32.f32 %v665_v10  ;;  %v976_v2 = vsel %vm843_vm0, 1.0, %v1082_v4 }
0x10ac   :  { %v680_v51 = vsel %vm679_vm1, %v661_v46, %v662_v49  ;;  %vm858_vm1 = vcmask 7168  }
0x10ad   :  { %669 = vmin.xlane.f32.xlu0 %v668_v50  ;;  %v682_v52 = vshra.s32 %v680_v51, 16  ;;  %v681_v13 = vand.u32 65535, %v680_v51 }
0x10af   :  { %v684_v55 = vcvt.s32.f32 %v682_v52  ;;  %v683_v16 = vcvt.s32.f32 %v681_v13 }
0x10b1   :  { %685 = vmin.xlane.f32.xlu1 %v684_v55 }
0x1136   :  { %v670_v11 = vpop.xlane.xlu0 %669 }
0x1137   :  { %vm671_vm2 = vcmp.eq.f32.partialorder %v668_v50, %v670_v11  ;;  %v676_v40 = vcvt.f32.s32 %v670_v11 }
0x1138   :  { %v672_v14 = vsel %vm671_vm2, %v667_v12, inf }
0x1139   :  { %673 = vmin.xlane.f32.xlu0 %v672_v14  ;;  %v677_v42 = vshll.u32 %v676_v40, 16 }
0x113a   :  { %v686_v15 = vpop.xlane.xlu1 %685 }
0x113b   :  { %vm687_vm3 = vcmp.eq.f32.partialorder %v684_v55, %v686_v15  ;;  %v692_v43 = vcvt.f32.s32 %v686_v15  ;;  %v1032_v15 = vld [vmem:[%s1503_s0] sm:$0xff] }
0x113c   :  { %v688_v19 = vsel %vm687_vm3, %v683_v16, inf }
0x113d   :  { %689 = vmin.xlane.f32.xlu1 %v688_v19  ;;  %v693_v49 = vshll.u32 %v692_v43, 16  ;;  %v1033_v19 = vld [vmem:[%s1503_s0 + $0x8] sm:$0xff]  ;;  %s1083_s0 = smov [#allocation2]  }
0x113e   :  { %s944_s4 = sshll.u32 %s1083_s0, 4  ;;  %s945_s4 = int_to_ptr.vmem [resolvable:$true] %s944_s4 }
0x113f   :  { %s1038_s21 = scalar_lea.vmem %s945_s4, 256  ;;  %p1043_p1 = scmp.lt.s32.totalorder %s945_s4, %s945_s4 }
0x1140   :  { %p1039_p0 = scmp.ne.s32.totalorder %s945_s4, %s1038_s21  ;;  %p1044_p2 = scmp.lt.s32.totalorder %s1038_s21, %s1038_s21 }
0x1142   :  { %p1045_p3 = por %p1044_p2, %p1043_p1 }
0x1144   :  { %p1046_p4 = pnand %p1045_p3, %p1039_p0 }
0x11c2   :  { %v674_v41 = vpop.xlane.xlu0 %673 }
0x11c3   :  { %v675_v44 = vcvt.f32.s32 %v674_v41 }
0x11c5   :  { %v678_v45 = vadd.s32 %v677_v42, %v675_v44 }
0x11c6   :  { %v690_v46 = vpop.xlane.xlu1 %689 }
0x11c7   :  { %vm695_vm4 = vcmp.eq.s32.totalorder %v1252_v56, %v678_v45  ;;  %vm696_vm5 = vcmp.eq.s32.totalorder %v1255_v57, %v678_v45  ;;  %v691_v50 = vcvt.f32.s32 %v690_v46 }
0x11c8   :  { %v699_v51 = vsel %vm695_vm4, -1e+30, %v1335_v32  ;;  %v700_v52 = vsel %vm696_vm5, -1e+30, %v1337_v33 }
0x11c9   :  { %vm703_vm6 = vcmp.eq.f32.partialorder %v699_v51, -1e+30  ;;  %vm704_vm7 = vcmp.eq.f32.partialorder %v700_v52, -1e+30  ;;  %v694_v55 = vadd.s32 %v693_v49, %v691_v50 }
0x11ca   :  { %v707_v58 = vsel %vm703_vm6, %v1240_v47, 0.0  ;;  %v708_v59 = vsel %vm704_vm7, %v1242_v48, 0.0  ;;  %1034 = vmatprep.mubr.msk.f32.mxu1 %vm704_vm7, %v1242_v48 }
0x11cb   :  { %711 = vst [vmem:[#allocation4] sm:$0xff] %v707_v58  ;;  %712 = vst [vmem:[#allocation4 + $0x8] sm:$0xff] %v708_v59  ;;  %vm697_vm8 = vcmp.eq.s32.totalorder %v1252_v56, %v694_v55  ;;  %vm698_vm9 = vcmp.eq.s32.totalorder %v1255_v57, %v694_v55  ;;  %v871_v60 = vadd.f32 %v708_v59, %v707_v58  ;;  %1035 = vmatmul.mubr.msk.f32.vlgmr.msra.gmra.mxu1 %vm703_vm6, %v1240_v47 }
0x11cc   :  { %v701_v32 = vsel %vm697_vm8, -1e+30, %v1343_v37  ;;  %v702_v33 = vsel %vm698_vm9, -1e+30, %v1345_v38  ;;  %vm891_vm12 = vcmp.gt.f32.partialorder %v707_v58, 0.0  ;;  %vm892_vm13 = vcmp.gt.f32.partialorder %v708_v59, 0.0 }
0x11cd   :  { %vm705_vm10 = vcmp.eq.f32.partialorder %v701_v32, -1e+30  ;;  %vm706_vm11 = vcmp.eq.f32.partialorder %v702_v33, -1e+30  ;;  %872 = vadd.xlane.f32.xlu1 %v871_v60  ;;  %v977_v47 = vsel %vm891_vm12, 1.0, %v1082_v4  ;;  %v978_v57 = vsel %vm892_vm13, 1.0, %v1082_v4 }
0x11ce   :  { %v709_v61 = vsel %vm705_vm10, %v1246_v53, 0.0  ;;  %v710_v62 = vsel %vm706_vm11, %v1248_v54, 0.0  ;;  %1036 = vmatprep.mubr.msk.f32.mxu1 %vm706_vm11, %v1248_v54  ;;  %v903_v0 = vadd.f32 %v978_v57, %v977_v47 }
0x11cf   :  { %713 = vst [vmem:[#allocation4 + $0x10] sm:$0xff] %v709_v61  ;;  %714 = vst [vmem:[#allocation4 + $0x18] sm:$0xff] %v710_v62  ;;  %v874_v48 = vadd.f32 %v710_v62, %v709_v61  ;;  %vm893_vm14 = vcmp.gt.f32.partialorder %v709_v61, 0.0  ;;  %vm894_vm15 = vcmp.gt.f32.partialorder %v710_v62, 0.0  ;;  %1037 = vmatmul.mubr.msk.f32.gmra.mxu1 %vm705_vm10, %v1246_v53 }
0x11d0   :  { %v979_v37 = vsel %vm893_vm14, 1.0, %v1082_v4  ;;  %v980_v38 = vsel %vm894_vm15, 1.0, %v1082_v4 }
0x11d1   :  { %875 = vadd.xlane.f32.xlu1 %v874_v48  ;;  %v906_v63 = vadd.f32 %v980_v38, %v979_v37 }
0x11d5   :  { %904 = vadd.xlane.f32.xlu1 %v903_v0 }
0x1256   :  { %v873_v54 = vpop.xlane.xlu1 %872 }
0x1257   :  { %v879_v5 = vsel %vm858_vm1, %v873_v54, 0.0 }
0x125a   :  { %v876_v53 = vpop.xlane.xlu1 %875 }
0x125b   :  { %v878_v3 = vmul.f32 %v976_v2, %v876_v53 }
0x125d   :  { %v880_v6 = vsel %vm858_vm1, %v878_v3, 0.0 }
0x125e   :  { %v881_v7 = vadd.f32 %v880_v6, %v879_v5  ;;  %v905_v27 = vpop.xlane.xlu1 %904 }
0x125f   :  { %v911_v31 = vsel %vm858_vm1, %v905_v27, 0.0 }
0x1260   :  { %882 = vadd.xlane.f32.xlu1 %v881_v7 }
0x128b   :  { %v1013_v8 = vpop.f32.mrf.mxu1 }
0x128d   :  { %v1014_v10 = vpop.f32.mrf.mxu1 }
0x128e   :  { %v1015_v11 = vadd.f32 %v1014_v10, %v1013_v8 }
0x128f   :  { %v1016_v12 = vpop.f32.mrf.mxu1 }
0x1290   :  { %v825_v13 = vadd.f32 %v1015_v11, %v975_v9 }
0x1291   :  { %v1017_v14 = vpop.f32.mrf.mxu1 }
0x1292   :  { %833 = vst [vmem:[#allocation2] sm:$0xff] %v825_v13  ;;  %v1018_v4 = vadd.f32 %v1017_v14, %v1016_v12  ;;  %v848_v16 = vsub.f32 %v825_v13, %v1032_v15 }
0x1294   :  { %v830_v17 = vadd.f32 %v1018_v4, %v975_v9  ;;  %v850_v18 = vmul.f32 %v848_v16, %v848_v16 }
0x1296   :  { %834 = vst [vmem:[#allocation2 + $0x8] sm:$0xff] %v830_v17  ;;  %852 = vadd.xlane.f32.xlu0 %v850_v18  ;;  %v849_v20 = vsub.f32 %v830_v17, %v1033_v19 }
0x1298   :  { %v851_v21 = vmul.f32 %v849_v20, %v849_v20 }
0x129a   :  { %854 = vadd.xlane.f32.xlu0 %v851_v21 }
0x129e   :  { %907 = vadd.xlane.f32.xlu0 %v906_v63 }
0x131f   :  { %v853_v22 = vpop.xlane.xlu0 %852 }
0x1320   :  { %v859_v25 = vsel %vm858_vm1, %v853_v22, 0.0 }
0x1323   :  { %v855_v23 = vpop.xlane.xlu0 %854 }
0x1324   :  { %v857_v24 = vmul.f32 %v976_v2, %v855_v23 }
0x1326   :  { %v860_v26 = vsel %vm858_vm1, %v857_v24, 0.0 }
0x1327   :  { %v908_v28 = vpop.xlane.xlu0 %907  ;;  %v861_v29 = vadd.f32 %v860_v26, %v859_v25 }
0x1328   :  { %v910_v30 = vmul.f32 %v976_v2, %v908_v28 }
0x1329   :  { %862 = vadd.xlane.f32.xlu0 %v861_v29 }
0x132a   :  { %v912_v34 = vsel %vm858_vm1, %v910_v30, 0.0 }
0x132b   :  { %v913_v35 = vadd.f32 %v912_v34, %v911_v31 }
0x132d   :  { %914 = vadd.xlane.f32.xlu0 %v913_v35 }
0x132e   :  { %1049 = shalt.err (!%p1046_p4)
}
0x132f   :  { %s1085_s22 = smov 128   ;;  %s1086_s1 = smov 8  }
0x1330   :  { %950 = dma.vmem_to_hbm [thread:$0]  %s945_s4, 256, %s1508_s5, [#allocation3], %s1085_s22, %s1085_s22, %s1086_s1  }
0x1331   :  { %s1058_s24 = scalar_lea.vmem %s957_s20, 512  ;;  %p1063_p6 = scmp.lt.s32.totalorder %s957_s20, %s957_s20 }
0x1332   :  { %p1059_p5 = scmp.ne.s32.totalorder %s957_s20, %s1058_s24  ;;  %p1064_p7 = scmp.lt.s32.totalorder %s1058_s24, %s1058_s24 }
0x1334   :  { %p1065_p8 = por %p1064_p7, %p1063_p6 }
0x1336   :  { %p1066_p9 = pnand %p1065_p8, %p1059_p5 }
0x1338   :  { %1069 = shalt.err (!%p1066_p9)
}
0x1339   :  { %s1087_s25 = smov 256   ;;  %s1088_s26 = smov 16   ;;  %v883_v39 = vpop.xlane.xlu1 %882  ;;  %vm923_vm2 = vcmp.eq.s32.totalorder %v1233_v36, 0  ;;  %vm924_vm3 = vcmp.eq.s32.totalorder %v1252_v56, 0  ;;  %vm928_vm4 = vcmp.eq.s32.totalorder %v1252_v56, 1  ;;  %vm933_vm7 = vcmp.eq.s32.totalorder %v1252_v56, 2 }
0x133a   :  { %962 = dma.vmem_to_hbm [thread:$0]  %s957_s20, 512, %s1509_s6, [#allocation5], %s1087_s25, %s1087_s25, %s1088_s26   ;;  %v884_v40 = vrot.slane %v883_v39, 4  ;;  %vm925_vm5 = vmand %vm923_vm2, %vm924_vm3 }
0x133b   :  { %vm929_vm6 = vmand %vm923_vm2, %vm928_vm4 }
0x133c   :  { %v885_v41 = vadd.f32 %v884_v40, %v883_v39  ;;  %vm934_vm8 = vmand %vm923_vm2, %vm933_vm7 }
0x133e   :  { %v886_v42 = vrot.slane %v885_v41, 2 }
0x1340   :  { %v887_v46 = vadd.f32 %v886_v42, %v885_v41 }
0x1342   :  { %v888_v58 = vrot.slane %v887_v46, 1 }
0x1344   :  { %v889_v61 = vadd.f32 %v888_v58, %v887_v46 }
0x13b2   :  { %v863_v43 = vpop.xlane.xlu0 %862 }
0x13b3   :  { %v864_v44 = vrot.slane %v863_v43, 4 }
0x13b5   :  { %v865_v45 = vadd.f32 %v864_v44, %v863_v43 }
0x13b6   :  { %v915_v49 = vpop.xlane.xlu0 %914 }
0x13b7   :  { %v866_v50 = vrot.slane %v865_v45, 2  ;;  %v916_v51 = vrot.slane %v915_v49, 4 }
0x13b9   :  { %v917_v52 = vadd.f32 %v916_v51, %v915_v49  ;;  %v867_v55 = vadd.f32 %v866_v50, %v865_v45 }
0x13bb   :  { %v918_v59 = vrot.slane %v917_v52, 2  ;;  %v868_v60 = vrot.slane %v867_v55, 1 }
0x13bd   :  { %v919_v32 = vadd.f32 %v918_v59, %v917_v52  ;;  %v869_v33 = vadd.f32 %v868_v60, %v867_v55 }
0x13bf   :  { %1019 = vpush %v869_v33  ;;  %v920_v62 = vrot.slane %v919_v32, 1 }
0x13c0   :  { %1021 = vpush %v889_v61 }
0x13c1   :  { %v921_v48 = vadd.f32 %v920_v62, %v919_v32 }
0x13c3   :  { %1023 = vpush %v921_v48 }
0x13f0   :  { %s1020_s5 = spop %1019 }
0x13f1   :  { %v926_v47 = vstv %s1020_s5  ;;  %s1022_s6 = spop %1021 }
0x13f2   :  { %v927_v57 = vsel %vm925_vm5, %v926_v47, 0.0  ;;  %v930_v37 = vstv %s1022_s6 }
0x13f3   :  { %v931_v38 = vsel %vm929_vm6, %v930_v37, 0.0 }
0x13f4   :  { %s1024_s29 = spop %1023  ;;  %v932_v63 = vadd.f32 %v931_v38, %v927_v57 }
0x13f5   :  { %v935_v0 = vstv %s1024_s29 }
0x13f6   :  { %v936_v1 = vsel %vm934_vm8, %v935_v0, 0.0 }
0x13f7   :  { %v937_v36 = vadd.f32 %v936_v1, %v932_v63 }
0x13f9   :  { %938 = vst [vmem:[%s1510_s7] sm:$0xff] %v937_v36 }
0x13fa   :  { %1078 = dma.done.wait [#allocation3], 256  }
0x13fb   :  { %1079 = vsyncadd [#allocation3], 4294967040 }
0x13fc   :  { %1080 = dma.done.wait [#allocation5], 512  }
0x13fd   :  { %1081 = vsyncadd [#allocation5], 4294966784 }
0x13fe   :  { %973 = vsyncpa [#allocation3], 1 }
0x13ff   :  { %974 = vsyncpa [#allocation5], 1 }

</bundles_post_ra>
